<compile_context>
chip_gen: v7x
topology: tpu7x:2x2x1
jax: 0.10.0
libtpu: 0.0.40
codegen_flags: <defaults>
</compile_context>

<pallas_src>
from functools import partial

import jax
import jax.numpy as jnp
from jax import lax
from jax.experimental import pallas as pl
from jax.experimental.pallas import tpu as pltpu


# ---------------------------------------------------------------------------
# Helpers
# ---------------------------------------------------------------------------
def _device_vmem_capacity():
    try:
        return int(pltpu.get_tpu_info().vmem_capacity_bytes)
    except Exception:
        return 64 * 1024 * 1024   # conservative default (v7x per-TensorCore)


def _clamp_vmem(request, cap):
    # Explicit limit (never rely on scoped defaults), clamped to 3/4 of the
    # device's physical VMEM so v7x (64 MiB) never sees an impossible request.
    return int(min((cap * 3) // 4, max(16 * 1024 * 1024, request)))


def _fused_vmem_estimate(c, n, hidden, dim, itemsize):
    f32 = 4
    io = 2 * (c + dim) * n * itemsize                          # double-buffered x / out
    weights = (3 * hidden * c + dim * hidden) * itemsize + hidden * hidden * f32 + 3 * dim * f32
    inter = (3 * hidden * n            # qkv
             + 2 * hidden * n          # softmax temporaries
             + 2 * hidden * hidden     # context + masked context
             + 2 * dim * n) * f32      # z / output temp
    return io + weights + inter


def _tiled_vmem_request(c, nt, hidden, dim, itemsize):
    f32 = 4
    io = 2 * (c + dim) * nt * max(itemsize, f32)
    weights = (3 * hidden * c + dim * hidden + hidden * hidden) * f32
    inter = (4 * hidden * nt + 2 * dim * nt + 3 * hidden * hidden) * f32
    return 2 * (io + weights + inter)


# ---------------------------------------------------------------------------
# Fused single-pass kernel (whole spatial extent resident in VMEM)
# ---------------------------------------------------------------------------
def _fused_kernel(x_ref, wqkv_ref, wout_ref, bout_ref, gn_w_ref, gn_b_ref,
                  mask_ref, o_ref, *, heads, dim_head, eps):
    hidden = heads * dim_head
    scale = dim_head ** -0.5
    n = x_ref.shape[-1]
    dim = o_ref.shape[1]
    inv_count = 1.0 / float(dim * n)

    # 1x1 conv (no bias) == matmul over flattened spatial positions.
    # NOTE: contraction K = c; for tiny c this matmul is MXU-underfilled but it
    # is not the dominant cost (real U-Net dims are 64-512).
    qkv = jnp.dot(wqkv_ref[...], x_ref[0],
                  preferred_element_type=jnp.float32)            # (3*hidden, n) f32
    q_raw = qkv[0:hidden, :]
    k_raw = qkv[hidden:2 * hidden, :]
    v = qkv[2 * hidden:3 * hidden, :]

    # ---- k.softmax(dim=-1): row-wise over spatial, all heads at once ----
    k_exp = jnp.exp(k_raw - jnp.max(k_raw, axis=1, keepdims=True))
    k = k_exp * pl.reciprocal(jnp.sum(k_exp, axis=1, keepdims=True), approx=True)

    # ---- q.softmax(dim=-2): over dim_head within each head; fold *scale ----
    q3 = q_raw.reshape(heads, dim_head, n)
    q3 = jnp.exp(q3 - jnp.max(q3, axis=1, keepdims=True))
    q3 = q3 * (scale * pl.reciprocal(jnp.sum(q3, axis=1, keepdims=True),
                                     approx=True))
    q = q3.reshape(hidden, n)

    # ---- all-head context^T in one MXU call; bf16 operands, f32 accumulate ----
    # context_t[e, d] = sum_n v[e, n] * k[d, n]
    context_t = lax.dot_general(v.astype(jnp.bfloat16), k.astype(jnp.bfloat16),
                                (((1,), (1,)), ((), ())),
                                preferred_element_type=jnp.float32)  # (hidden, hidden)

    # Hoisted block-diagonal head mask (constant input) -> blockdiag(context_h^T)
    blockdiag = context_t * mask_ref[...]

    # Fold to_out into W' = wout @ blockdiag(context^T)
    w_prime = jnp.dot(wout_ref[...].astype(jnp.float32), blockdiag,
                      preferred_element_type=jnp.float32)            # (dim, hidden)

    # Fused output projection (bf16 MXU operands, f32 accumulate); bias NOT yet added.
    z = jnp.dot(w_prime.astype(jnp.bfloat16), q.astype(jnp.bfloat16),
                preferred_element_type=jnp.float32)                  # (dim, n)

    # ---- fused bias + GroupNorm(1, dim) epilogue ----
    # Stats from pre-bias z via per-channel row sums; bout folded analytically.
    bout = bout_ref[...].astype(jnp.float32)                         # (dim, 1)
    row_sum = jnp.sum(z, axis=1, keepdims=True)                      # (dim, 1)
    s1 = jnp.sum(row_sum) + n * jnp.sum(bout)
    s2 = (jnp.sum(z * z) + 2.0 * jnp.sum(bout * row_sum)
          + n * jnp.sum(bout * bout))
    mean = s1 * inv_count
    var = jnp.maximum(s2 * inv_count - mean * mean, 0.0)
    rstd = lax.rsqrt(var + eps)
    a = gn_w_ref[...].astype(jnp.float32) * rstd                     # (dim, 1)
    shift = gn_b_ref[...].astype(jnp.float32) + (bout - mean) * a    # (dim, 1)
    # Single multiply-add pass over the (dim, n) slab.
    o_ref[0] = (z * a + shift).astype(o_ref.dtype)


def _linear_attention_fused(x_flat, wqkv, wout, bout, gn_w, gn_b, mask, *,
                            heads, dim_head, eps, vmem_cap, est):
    b, c, n = x_flat.shape
    hidden = heads * dim_head
    dim = wout.shape[0]
    itemsize = jnp.dtype(x_flat.dtype).itemsize

    kernel = partial(_fused_kernel, heads=heads, dim_head=dim_head, eps=eps)

    flops = b * (2 * 3 * hidden * c * n + 2 * hidden * hidden * n
                 + 2 * dim * hidden * hidden + 2 * dim * hidden * n)
    transcendentals = b * 2 * hidden * n
    bytes_accessed = (b * (c + dim) * n * itemsize
                      + (3 * hidden * c + dim * hidden) * jnp.dtype(wqkv.dtype).itemsize
                      + hidden * hidden * 4)
    cost = pl.CostEstimate(flops=int(flops),
                           transcendentals=int(transcendentals),
                           bytes_accessed=int(bytes_accessed))

    return pl.pallas_call(
        kernel,
        out_shape=jax.ShapeDtypeStruct((b, dim, n), x_flat.dtype),
        grid_spec=pltpu.PrefetchScalarGridSpec(
            num_scalar_prefetch=0,
            grid=(b,),
            in_specs=[
                pl.BlockSpec((1, c, n), lambda i: (i, 0, 0)),     # x
                pl.BlockSpec(wqkv.shape, lambda i: (0, 0)),       # to_qkv weight
                pl.BlockSpec(wout.shape, lambda i: (0, 0)),       # to_out conv weight
                pl.BlockSpec(bout.shape, lambda i: (0, 0)),       # to_out conv bias
                pl.BlockSpec(gn_w.shape, lambda i: (0, 0)),       # GroupNorm weight
                pl.BlockSpec(gn_b.shape, lambda i: (0, 0)),       # GroupNorm bias
                pl.BlockSpec(mask.shape, lambda i: (0, 0)),       # block-diag head mask
            ],
            out_specs=pl.BlockSpec((1, dim, n), lambda i: (i, 0, 0)),
        ),
        compiler_params=pltpu.CompilerParams(
            dimension_semantics=("parallel",),
            vmem_limit_bytes=_clamp_vmem(2 * est, vmem_cap),
        ),
        cost_estimate=cost,
    )(x_flat, wqkv, wout, bout, gn_w, gn_b, mask)


# ---------------------------------------------------------------------------
# Flash-style spatially tiled path (three passes, O(hidden * n_tile) VMEM)
# ---------------------------------------------------------------------------
def _context_kernel(x_ref, wkv_ref, wout_ref, mask_ref, wp_ref,
                    m_sc, z_sc, acc_sc, *, heads, dim_head):
    hidden = heads * dim_head
    j = pl.program_id(1)

    @pl.when(j == 0)
    def _():
        m_sc[...] = jnp.full_like(m_sc, -jnp.inf)
        z_sc[...] = jnp.zeros_like(z_sc)
        acc_sc[...] = jnp.zeros_like(acc_sc)

    kv = jnp.dot(wkv_ref[...], x_ref[0],
                 preferred_element_type=jnp.float32)                 # (2*hidden, nt)
    k_raw = kv[0:hidden, :]
    v = kv[hidden:2 * hidden, :]

    # Online softmax over the spatial axis (per k-channel row).
    m_new = jnp.maximum(m_sc[...], jnp.max(k_raw, axis=1, keepdims=True))
    alpha = jnp.exp(m_sc[...] - m_new)                               # (hidden, 1)
    p = jnp.exp(k_raw - m_new)                                       # (hidden, nt)
    z_sc[...] = alpha * z_sc[...] + jnp.sum(p, axis=1, keepdims=True)
    acc_sc[...] = alpha * acc_sc[...] + lax.dot_general(
        p.astype(jnp.bfloat16), v.astype(jnp.bfloat16),
        (((1,), (1,)), ((), ())),
        preferred_element_type=jnp.float32)                          # acc[d, e]
    m_sc[...] = m_new

    @pl.when(j == pl.num_programs(1) - 1)
    def _():
        ctx = acc_sc[...] * pl.reciprocal(z_sc[...], approx=True)    # context[d, e]
        ct = jnp.transpose(ctx) * mask_ref[...]                      # blockdiag(ctx^T)[e, d]
        wp_ref[0] = jnp.dot(wout_ref[...].astype(jnp.float32), ct,
                            preferred_element_type=jnp.float32)      # (dim, hidden)


def _output_kernel(x_ref, wq_ref, wp_ref, bout_ref, y_ref, s1_ref, s2_ref,
                   *, heads, dim_head):
    hidden = heads * dim_head
    scale = dim_head ** -0.5
    nt = x_ref.shape[-1]
    j = pl.program_id(1)

    q_raw = jnp.dot(wq_ref[...], x_ref[0],
                    preferred_element_type=jnp.float32)              # (hidden, nt)
    q3 = q_raw.reshape(heads, dim_head, nt)
    q3 = jnp.exp(q3 - jnp.max(q3, axis=1, keepdims=True))
    q3 = q3 * (scale * pl.reciprocal(jnp.sum(q3, axis=1, keepdims=True),
                                     approx=True))
    q = q3.reshape(hidden, nt)

    y = jnp.dot(wp_ref[0].astype(jnp.bfloat16), q.astype(jnp.bfloat16),
                preferred_element_type=jnp.float32)                  # (dim, nt)
    y = y + bout_ref[...].astype(jnp.float32)
    y_ref[0] = y

    @pl.when(j == 0)
    def _():
        s1_ref[...] = jnp.zeros_like(s1_ref)
        s2_ref[...] = jnp.zeros_like(s2_ref)
    s1_ref[...] += jnp.sum(y)          # scalar broadcast into the lane-dense block
    s2_ref[...] += jnp.sum(y * y)


def _norm_kernel(y_ref, a_ref, b_ref, o_ref):
    o_ref[0] = (y_ref[0] * a_ref[0] + b_ref[0]).astype(o_ref.dtype)


def _linear_attention_tiled(x_flat, wqkv, wout, bout, gn_w, gn_b, mask, *,
                            heads, dim_head, eps, n_tile, vmem_cap):
    b, c, n = x_flat.shape
    hidden = heads * dim_head
    dim = wout.shape[0]
    nt = n_tile
    assert n % nt == 0 and nt % 128 == 0
    n_tiles = n // nt
    itemsize = jnp.dtype(x_flat.dtype).itemsize
    vmem_limit = _clamp_vmem(_tiled_vmem_request(c, nt, hidden, dim, itemsize),
                             vmem_cap)

    wq = wqkv[0:hidden]
    wkv = wqkv[hidden:]

    # ---- pass 1: streaming context -> folded projection W' per batch ----
    wprime = pl.pallas_call(
        partial(_context_kernel, heads=heads, dim_head=dim_head),
        out_shape=jax.ShapeDtypeStruct((b, dim, hidden), jnp.float32),
        grid_spec=pltpu.PrefetchScalarGridSpec(
            num_scalar_prefetch=0,
            grid=(b, n_tiles),
            in_specs=[
                pl.BlockSpec((1, c, nt), lambda i, j: (i, 0, j)),
                pl.BlockSpec(wkv.shape, lambda i, j: (0, 0)),
                pl.BlockSpec(wout.shape, lambda i, j: (0, 0)),
                pl.BlockSpec(mask.shape, lambda i, j: (0, 0)),
            ],
            out_specs=pl.BlockSpec((1, dim, hidden), lambda i, j: (i, 0, 0)),
            scratch_shapes=[
                pltpu.VMEM((hidden, 1), jnp.float32),        # running max
                pltpu.VMEM((hidden, 1), jnp.float32),        # running denom
                pltpu.VMEM((hidden, hidden), jnp.float32),   # context numerator
            ],
        ),
        compiler_params=pltpu.CompilerParams(
            dimension_semantics=("parallel", "arbitrary"),
            vmem_limit_bytes=vmem_limit,
        ),
    )(x_flat, wkv, wout, mask)

    # ---- pass 2: q-softmax + output projection + GN stats accumulation ----
    y_buf, s1_buf, s2_buf = pl.pallas_call(
        partial(_output_kernel, heads=heads, dim_head=dim_head),
        out_shape=(jax.ShapeDtypeStruct((b, dim, n), jnp.float32),
                   jax.ShapeDtypeStruct((b, 1, 128), jnp.float32),
                   jax.ShapeDtypeStruct((b, 1, 128), jnp.float32)),
        grid_spec=pltpu.PrefetchScalarGridSpec(
            num_scalar_prefetch=0,
            grid=(b, n_tiles),
            in_specs=[
                pl.BlockSpec((1, c, nt), lambda i, j: (i, 0, j)),
                pl.BlockSpec(wq.shape, lambda i, j: (0, 0)),
                pl.BlockSpec((1, dim, hidden), lambda i, j: (i, 0, 0)),
                pl.BlockSpec(bout.shape, lambda i, j: (0, 0)),
            ],
            out_specs=[
                pl.BlockSpec((1, dim, nt), lambda i, j: (i, 0, j)),
                pl.BlockSpec((1, 1, 128), lambda i, j: (i, 0, 0)),
                pl.BlockSpec((1, 1, 128), lambda i, j: (i, 0, 0)),
            ],
        ),
        compiler_params=pltpu.CompilerParams(
            dimension_semantics=("parallel", "arbitrary"),
            vmem_limit_bytes=vmem_limit,
        ),
    )(x_flat, wq, wprime, bout)

    # ---- GroupNorm(1, dim) stats -> per-(batch, channel) scale/shift (tiny) ----
    inv_count = 1.0 / float(dim * n)
    s1 = s1_buf[:, 0, 0]
    s2 = s2_buf[:, 0, 0]
    mean = s1 * inv_count
    var = jnp.maximum(s2 * inv_count - mean * mean, 0.0)
    rstd = lax.rsqrt(var + eps)
    a = gn_w.astype(jnp.float32).reshape(1, dim, 1) * rstd.reshape(b, 1, 1)
    shift = gn_b.astype(jnp.float32).reshape(1, dim, 1) - mean.reshape(b, 1, 1) * a

    # ---- pass 3: normalize on writeback (one fused mul+add per element) ----
    out_flat = pl.pallas_call(
        _norm_kernel,
        out_shape=jax.ShapeDtypeStruct((b, dim, n), x_flat.dtype),
        grid_spec=pltpu.PrefetchScalarGridSpec(
            num_scalar_prefetch=0,
            grid=(b, n_tiles),
            in_specs=[
                pl.BlockSpec((1, dim, nt), lambda i, j: (i, 0, j)),
                pl.BlockSpec((1, dim, 1), lambda i, j: (i, 0, 0)),
                pl.BlockSpec((1, dim, 1), lambda i, j: (i, 0, 0)),
            ],
            out_specs=pl.BlockSpec((1, dim, nt), lambda i, j: (i, 0, j)),
        ),
        compiler_params=pltpu.CompilerParams(
            dimension_semantics=("parallel", "parallel"),
            vmem_limit_bytes=vmem_limit,
        ),
    )(y_buf, a, shift)

    return out_flat


# ---------------------------------------------------------------------------
# Public wrapper (path dispatch)
# ---------------------------------------------------------------------------
def linear_attention(x, wqkv, wout, bout, gn_w, gn_b, *, heads, dim_head,
                     eps=1e-5, force_tiled=False, n_tile=None):
    b, c, h, w = x.shape
    n = h * w
    hidden = heads * dim_head
    dim = wout.shape[0]
    assert n % 128 == 0, "spatial extent must be a multiple of 128"
    # TODO(synk): pad + mask the spatial axis for arbitrary H, W.

    x_flat = x.reshape(b, c, n)
    bout = jnp.reshape(bout, (dim, 1))
    gn_w = jnp.reshape(gn_w, (dim, 1))
    gn_b = jnp.reshape(gn_b, (dim, 1))

    # Hoisted block-diagonal head mask (computed once per call, outside kernel).
    head_id = jnp.arange(hidden, dtype=jnp.int32) // dim_head
    mask = (head_id[:, None] == head_id[None, :]).astype(jnp.float32)

    cap = _device_vmem_capacity()
    est = _fused_vmem_estimate(c, n, hidden, dim, jnp.dtype(x.dtype).itemsize)
    use_tiled = force_tiled or (2 * est > (cap * 3) // 4)

    if not use_tiled:
        out_flat = _linear_attention_fused(
            x_flat, wqkv, wout, bout, gn_w, gn_b, mask,
            heads=heads, dim_head=dim_head, eps=eps, vmem_cap=cap, est=est)
    else:
        if n_tile is None:
            n_tile = next(t for t in (1024, 512, 256, 128) if n % t == 0)
        out_flat = _linear_attention_tiled(
            x_flat, wqkv, wout, bout, gn_w, gn_b, mask,
            heads=heads, dim_head=dim_head, eps=eps, n_tile=n_tile, vmem_cap=cap)

    return out_flat.reshape(b, dim, h, w)


# ---------------------------------------------------------------------------
# Pure-JAX reference matching the PyTorch module
# ---------------------------------------------------------------------------
def linear_attention_ref(x, wqkv, wout, bout, gn_w, gn_b, *, heads, dim_head,
                         eps=1e-5):
    b, c, h, w = x.shape
    n = h * w
    hidden = heads * dim_head
    scale = dim_head ** -0.5
    xf = x.reshape(b, c, n).astype(jnp.float32)
    qkv = jnp.einsum('oc,bcn->bon', wqkv.astype(jnp.float32), xf)
    q, k, v = jnp.split(qkv, 3, axis=1)
    q = q.reshape(b, heads, dim_head, n)
    k = k.reshape(b, heads, dim_head, n)
    v = v.reshape(b, heads, dim_head, n)
    q = jax.nn.softmax(q, axis=-2) * scale
    k = jax.nn.softmax(k, axis=-1)
    context = jnp.einsum('bhdn,bhen->bhde', k, v)
    out = jnp.einsum('bhde,bhdn->bhen', context, q).reshape(b, hidden, n)
    y = jnp.einsum('oh,bhn->bon', wout.astype(jnp.float32), out)
    y = y + bout.reshape(1, -1, 1)
    mean = y.mean(axis=(1, 2), keepdims=True)
    var = ((y - mean) ** 2).mean(axis=(1, 2), keepdims=True)
    y = (y - mean) * lax.rsqrt(var + eps)
    y = y * gn_w.reshape(1, -1, 1) + gn_b.reshape(1, -1, 1)
    return y.reshape(b, c, h, w)


if __name__ == "__main__":
    # dim=8, heads=4, dim_head=32 -> hidden=128, spatial 16x16 (n=256).
    B, DIM, H, W = 2, 8, 16, 16
    HEADS, DIM_HEAD = 4, 32
    HIDDEN = HEADS * DIM_HEAD

    key = jax.random.PRNGKey(0)
    kx, kq, ko, kb, kg, kh = jax.random.split(key, 6)

    x = jax.random.normal(kx, (B, DIM, H, W), dtype=jnp.float32)
    wqkv = jax.random.normal(kq, (3 * HIDDEN, DIM), dtype=jnp.float32) * (DIM ** -0.5)
    wout = jax.random.normal(ko, (DIM, HIDDEN), dtype=jnp.float32) * (HIDDEN ** -0.5)
    bout = jax.random.normal(kb, (DIM,), dtype=jnp.float32) * 0.01
    gn_w = 1.0 + 0.1 * jax.random.normal(kg, (DIM,), dtype=jnp.float32)
    gn_b = 0.1 * jax.random.normal(kh, (DIM,), dtype=jnp.float32)

    y_ref = linear_attention_ref(x, wqkv, wout, bout, gn_w, gn_b,
                                 heads=HEADS, dim_head=DIM_HEAD)

    # Fused (VMEM-resident) path — chosen automatically at this size.
    y_fused = linear_attention(x, wqkv, wout, bout, gn_w, gn_b,
                               heads=HEADS, dim_head=DIM_HEAD)
    jax.block_until_ready(y_fused)
    assert y_fused.shape == (B, DIM, H, W)

    # Flash-style spatially tiled path (forced; 2 tiles of 128 positions each).
    y_tiled = linear_attention(x, wqkv, wout, bout, gn_w, gn_b,
                               heads=HEADS, dim_head=DIM_HEAD,
                               force_tiled=True, n_tile=128)
    jax.block_until_ready(y_tiled)
    assert y_tiled.shape == (B, DIM, H, W)

    # Loose tolerance: bf16 MXU operands, EUP approximate reciprocals and
    # one-pass variance versus the f32 reference.
    for name, y in (("fused", y_fused), ("tiled", y_tiled)):
        max_err = float(jnp.max(jnp.abs(y - y_ref)))
        mean_err = float(jnp.mean(jnp.abs(y - y_ref)))
        assert max_err < 1e-1 and mean_err < 2e-2, (
            f"{name} mismatch vs reference: max {max_err}, mean {mean_err}")

    print("KERNEL_OK")
</pallas_src>

<mosaic_0001>
module attributes {stable_mosaic.version = 11 : i64} {
  func.func @_fused_kernel(%arg0: i32, %arg1: memref<1x8x256xf32, #tpu.memory_space<vmem>>, %arg2: memref<384x8xf32, #tpu.memory_space<vmem>>, %arg3: memref<8x128xf32, #tpu.memory_space<vmem>>, %arg4: memref<8x1xf32, #tpu.memory_space<vmem>>, %arg5: memref<8x1xf32, #tpu.memory_space<vmem>>, %arg6: memref<8x1xf32, #tpu.memory_space<vmem>>, %arg7: memref<128x128xf32, #tpu.memory_space<vmem>>, %arg8: memref<1x8x256xf32, #tpu.memory_space<vmem>>) attributes {dimension_semantics = [#tpu.dimension_semantics<parallel>], iteration_bounds = array<i64: 2>, scalar_prefetch = 0 : i64, scratch_operands = 0 : i64, tpu.core_type = #tpu.core_type<tc>, window_params = [{transform_indices = @transform_0, window_bounds = array<i64: 1, 8, 256>}, {pipeline_mode = #tpu.pipeline_mode<synchronous>, transform_indices = @transform_1, window_bounds = array<i64: 384, 8>}, {pipeline_mode = #tpu.pipeline_mode<synchronous>, transform_indices = @transform_2, window_bounds = array<i64: 8, 128>}, {pipeline_mode = #tpu.pipeline_mode<synchronous>, transform_indices = @transform_3, window_bounds = array<i64: 8, 1>}, {pipeline_mode = #tpu.pipeline_mode<synchronous>, transform_indices = @transform_4, window_bounds = array<i64: 8, 1>}, {pipeline_mode = #tpu.pipeline_mode<synchronous>, transform_indices = @transform_5, window_bounds = array<i64: 8, 1>}, {pipeline_mode = #tpu.pipeline_mode<synchronous>, transform_indices = @transform_6, window_bounds = array<i64: 128, 128>}, {transform_indices = @transform_7, window_bounds = array<i64: 1, 8, 256>}]} {
    %c0 = arith.constant 0 : index
    %c0_0 = arith.constant 0 : index
    %0 = vector.load %arg2[%c0, %c0_0] : memref<384x8xf32, #tpu.memory_space<vmem>>, vector<384x8xf32>
    %c0_1 = arith.constant 0 : index
    %c0_2 = arith.constant 0 : index
    %c0_3 = arith.constant 0 : index
    %1 = vector.load %arg1[%c0_1, %c0_2, %c0_3] : memref<1x8x256xf32, #tpu.memory_space<vmem>>, vector<1x8x256xf32>
    %2 = vector.shape_cast %1 : vector<1x8x256xf32> to vector<8x256xf32>
    %cst = arith.constant dense<0.000000e+00> : vector<384x256xf32>
    %3 = tpu.matmul %0, %2, %cst {dimension_numbers = #tpu.dot_dimension_numbers<[1], [0], [0], [1], [0, 0, 1, 1], [], []>} : vector<384x8xf32>, vector<8x256xf32>, vector<384x256xf32> -> vector<384x256xf32>
    %4 = vector.extract_strided_slice %3 {offsets = [0, 0], sizes = [128, 256], strides = [1, 1]} : vector<384x256xf32> to vector<128x256xf32>
    %5 = vector.extract_strided_slice %3 {offsets = [128, 0], sizes = [128, 256], strides = [1, 1]} : vector<384x256xf32> to vector<128x256xf32>
    %6 = vector.extract_strided_slice %3 {offsets = [256, 0], sizes = [128, 256], strides = [1, 1]} : vector<384x256xf32> to vector<128x256xf32>
    %cst_4 = arith.constant dense<0xFF800000> : vector<128xf32>
    %7 = vector.multi_reduction <maximumf>, %5, %cst_4 [1] : vector<128x256xf32> to vector<128xf32>
    %8 = vector.shape_cast %7 : vector<128xf32> to vector<128x1xf32>
    %9 = vector.broadcast %8 : vector<128x1xf32> to vector<128x256xf32>
    %10 = arith.subf %5, %9 : vector<128x256xf32>
    %11 = math.exp %10 : vector<128x256xf32>
    %cst_5 = arith.constant dense<0.000000e+00> : vector<128xf32>
    %12 = vector.multi_reduction <add>, %11, %cst_5 [1] : vector<128x256xf32> to vector<128xf32>
    %13 = vector.shape_cast %12 : vector<128xf32> to vector<128x1xf32>
    %14 = tpu.reciprocal %13 {approx = true} : vector<128x1xf32> -> vector<128x1xf32>
    %15 = vector.broadcast %14 : vector<128x1xf32> to vector<128x256xf32>
    %16 = arith.mulf %11, %15 : vector<128x256xf32>
    %17 = vector.shape_cast %4 : vector<128x256xf32> to vector<4x32x256xf32>
    %cst_6 = arith.constant dense<0xFF800000> : vector<4x256xf32>
    %18 = vector.multi_reduction <maximumf>, %17, %cst_6 [1] : vector<4x32x256xf32> to vector<4x256xf32>
    %19 = vector.shape_cast %18 : vector<4x256xf32> to vector<4x1x256xf32>
    %20 = vector.broadcast %19 : vector<4x1x256xf32> to vector<4x32x256xf32>
    %21 = arith.subf %17, %20 : vector<4x32x256xf32>
    %22 = math.exp %21 : vector<4x32x256xf32>
    %cst_7 = arith.constant dense<0.000000e+00> : vector<4x256xf32>
    %23 = vector.multi_reduction <add>, %22, %cst_7 [1] : vector<4x32x256xf32> to vector<4x256xf32>
    %24 = vector.shape_cast %23 : vector<4x256xf32> to vector<4x1x256xf32>
    %25 = tpu.reciprocal %24 {approx = true} : vector<4x1x256xf32> -> vector<4x1x256xf32>
    %cst_8 = arith.constant 0.176776692 : f32
    %26 = vector.broadcast %cst_8 : f32 to vector<4x1x256xf32>
    %27 = arith.mulf %26, %25 : vector<4x1x256xf32>
    %28 = vector.broadcast %27 : vector<4x1x256xf32> to vector<4x32x256xf32>
    %29 = arith.mulf %22, %28 : vector<4x32x256xf32>
    %30 = vector.shape_cast %29 : vector<4x32x256xf32> to vector<128x256xf32>
    %31 = arith.truncf %6 : vector<128x256xf32> to vector<128x256xbf16>
    %32 = arith.truncf %16 : vector<128x256xf32> to vector<128x256xbf16>
    %cst_9 = arith.constant dense<0.000000e+00> : vector<128x128xf32>
    %33 = tpu.matmul %31, %32, %cst_9 {dimension_numbers = #tpu.dot_dimension_numbers<[1], [1], [0], [0], [0, 0, 1, 0], [], []>} : vector<128x256xbf16>, vector<128x256xbf16>, vector<128x128xf32> -> vector<128x128xf32>
    %c0_10 = arith.constant 0 : index
    %c0_11 = arith.constant 0 : index
    %34 = vector.load %arg7[%c0_10, %c0_11] : memref<128x128xf32, #tpu.memory_space<vmem>>, vector<128x128xf32>
    %35 = arith.mulf %33, %34 : vector<128x128xf32>
    %c0_12 = arith.constant 0 : index
    %c0_13 = arith.constant 0 : index
    %36 = vector.load %arg3[%c0_12, %c0_13] : memref<8x128xf32, #tpu.memory_space<vmem>>, vector<8x128xf32>
    %cst_14 = arith.constant dense<0.000000e+00> : vector<8x128xf32>
    %37 = tpu.matmul %36, %35, %cst_14 {dimension_numbers = #tpu.dot_dimension_numbers<[1], [0], [0], [1], [0, 0, 1, 1], [], []>} : vector<8x128xf32>, vector<128x128xf32>, vector<8x128xf32> -> vector<8x128xf32>
    %38 = arith.truncf %37 : vector<8x128xf32> to vector<8x128xbf16>
    %39 = arith.truncf %30 : vector<128x256xf32> to vector<128x256xbf16>
    %cst_15 = arith.constant dense<0.000000e+00> : vector<8x256xf32>
    %40 = tpu.matmul %38, %39, %cst_15 {dimension_numbers = #tpu.dot_dimension_numbers<[1], [0], [0], [1], [0, 0, 1, 1], [], []>} : vector<8x128xbf16>, vector<128x256xbf16>, vector<8x256xf32> -> vector<8x256xf32>
    %c0_16 = arith.constant 0 : index
    %c0_17 = arith.constant 0 : index
    %41 = vector.load %arg4[%c0_16, %c0_17] : memref<8x1xf32, #tpu.memory_space<vmem>>, vector<8x1xf32>
    %cst_18 = arith.constant dense<0.000000e+00> : vector<8xf32>
    %42 = vector.multi_reduction <add>, %40, %cst_18 [1] : vector<8x256xf32> to vector<8xf32>
    %43 = vector.shape_cast %42 : vector<8xf32> to vector<8x1xf32>
    %44 = vector.shape_cast %43 : vector<8x1xf32> to vector<1x8x1xf32>
    %cst_19 = arith.constant dense<0.000000e+00> : vector<1xf32>
    %45 = vector.multi_reduction <add>, %44, %cst_19 [1, 2] : vector<1x8x1xf32> to vector<1xf32>
    %46 = vector.shape_cast %45 : vector<1xf32> to vector<1x1x1xf32>
    %47 = vector.extract %46[0, 0, 0] : f32 from vector<1x1x1xf32>
    %48 = vector.shape_cast %41 : vector<8x1xf32> to vector<1x8x1xf32>
    %cst_20 = arith.constant dense<0.000000e+00> : vector<1xf32>
    %49 = vector.multi_reduction <add>, %48, %cst_20 [1, 2] : vector<1x8x1xf32> to vector<1xf32>
    %50 = vector.shape_cast %49 : vector<1xf32> to vector<1x1x1xf32>
    %51 = vector.extract %50[0, 0, 0] : f32 from vector<1x1x1xf32>
    %cst_21 = arith.constant 2.560000e+02 : f32
    %52 = arith.mulf %cst_21, %51 : f32
    %53 = arith.addf %47, %52 : f32
    %54 = arith.mulf %40, %40 : vector<8x256xf32>
    %55 = vector.shape_cast %54 : vector<8x256xf32> to vector<1x8x256xf32>
    %cst_22 = arith.constant dense<0.000000e+00> : vector<1xf32>
    %56 = vector.multi_reduction <add>, %55, %cst_22 [1, 2] : vector<1x8x256xf32> to vector<1xf32>
    %57 = vector.shape_cast %56 : vector<1xf32> to vector<1x1x1xf32>
    %58 = vector.extract %57[0, 0, 0] : f32 from vector<1x1x1xf32>
    %59 = arith.mulf %41, %43 : vector<8x1xf32>
    %60 = vector.shape_cast %59 : vector<8x1xf32> to vector<1x8x1xf32>
    %cst_23 = arith.constant dense<0.000000e+00> : vector<1xf32>
    %61 = vector.multi_reduction <add>, %60, %cst_23 [1, 2] : vector<1x8x1xf32> to vector<1xf32>
    %62 = vector.shape_cast %61 : vector<1xf32> to vector<1x1x1xf32>
    %63 = vector.extract %62[0, 0, 0] : f32 from vector<1x1x1xf32>
    %cst_24 = arith.constant 2.000000e+00 : f32
    %64 = arith.mulf %cst_24, %63 : f32
    %65 = arith.addf %58, %64 : f32
    %66 = arith.mulf %41, %41 : vector<8x1xf32>
    %67 = vector.shape_cast %66 : vector<8x1xf32> to vector<1x8x1xf32>
    %cst_25 = arith.constant dense<0.000000e+00> : vector<1xf32>
    %68 = vector.multi_reduction <add>, %67, %cst_25 [1, 2] : vector<1x8x1xf32> to vector<1xf32>
    %69 = vector.shape_cast %68 : vector<1xf32> to vector<1x1x1xf32>
    %70 = vector.extract %69[0, 0, 0] : f32 from vector<1x1x1xf32>
    %cst_26 = arith.constant 2.560000e+02 : f32
    %71 = arith.mulf %cst_26, %70 : f32
    %72 = arith.addf %65, %71 : f32
    %cst_27 = arith.constant 4.8828125E-4 : f32
    %73 = arith.mulf %53, %cst_27 : f32
    %cst_28 = arith.constant 4.8828125E-4 : f32
    %74 = arith.mulf %72, %cst_28 : f32
    %75 = arith.mulf %73, %73 : f32
    %76 = arith.subf %74, %75 : f32
    %cst_29 = arith.constant 0.000000e+00 : f32
    %77 = arith.maximumf %76, %cst_29 : f32
    %cst_30 = arith.constant 9.99999974E-6 : f32
    %78 = arith.addf %77, %cst_30 : f32
    %79 = math.rsqrt %78 : f32
    %c0_31 = arith.constant 0 : index
    %c0_32 = arith.constant 0 : index
    %80 = vector.load %arg5[%c0_31, %c0_32] : memref<8x1xf32, #tpu.memory_space<vmem>>, vector<8x1xf32>
    %81 = vector.broadcast %79 : f32 to vector<8x1xf32>
    %82 = arith.mulf %80, %81 : vector<8x1xf32>
    %c0_33 = arith.constant 0 : index
    %c0_34 = arith.constant 0 : index
    %83 = vector.load %arg6[%c0_33, %c0_34] : memref<8x1xf32, #tpu.memory_space<vmem>>, vector<8x1xf32>
    %84 = vector.broadcast %73 : f32 to vector<8x1xf32>
    %85 = arith.subf %41, %84 : vector<8x1xf32>
    %86 = arith.mulf %85, %82 : vector<8x1xf32>
    %87 = arith.addf %83, %86 : vector<8x1xf32>
    %88 = vector.broadcast %82 : vector<8x1xf32> to vector<8x256xf32>
    %89 = arith.mulf %40, %88 : vector<8x256xf32>
    %90 = vector.broadcast %87 : vector<8x1xf32> to vector<8x256xf32>
    %91 = arith.addf %89, %90 : vector<8x256xf32>
    %c0_35 = arith.constant 0 : index
    %c0_36 = arith.constant 0 : index
    %c0_37 = arith.constant 0 : index
    %92 = vector.load %arg8[%c0_35, %c0_36, %c0_37] : memref<1x8x256xf32, #tpu.memory_space<vmem>>, vector<1x8x256xf32>
    %93 = vector.shape_cast %92 : vector<1x8x256xf32> to vector<8x256xf32>
    %94 = vector.shape_cast %91 : vector<8x256xf32> to vector<1x8x256xf32>
    tpu.vector_store %arg8[%c0_35, %c0_36, %c0_37], %94 {strides = array<i32>} : memref<1x8x256xf32, #tpu.memory_space<vmem>>, vector<1x8x256xf32>,
    return
  }
  func.func @transform_0(%arg0: i32) -> (i32, i32, i32) {
    %c0_i32 = arith.constant 0 : i32
    %c0_i32_0 = arith.constant 0 : i32
    %c0_i32_1 = arith.constant 0 : i32
    return %arg0, %c0_i32, %c0_i32_0 : i32, i32, i32
  }
  func.func @transform_1(%arg0: i32) -> (i32, i32) {
    %c0_i32 = arith.constant 0 : i32
    %c0_i32_0 = arith.constant 0 : i32
    %c0_i32_1 = arith.constant 0 : i32
    return %c0_i32, %c0_i32_0 : i32, i32
  }
  func.func @transform_2(%arg0: i32) -> (i32, i32) {
    %c0_i32 = arith.constant 0 : i32
    %c0_i32_0 = arith.constant 0 : i32
    %c0_i32_1 = arith.constant 0 : i32
    return %c0_i32, %c0_i32_0 : i32, i32
  }
  func.func @transform_3(%arg0: i32) -> (i32, i32) {
    %c0_i32 = arith.constant 0 : i32
    %c0_i32_0 = arith.constant 0 : i32
    %c0_i32_1 = arith.constant 0 : i32
    return %c0_i32, %c0_i32_0 : i32, i32
  }
  func.func @transform_4(%arg0: i32) -> (i32, i32) {
    %c0_i32 = arith.constant 0 : i32
    %c0_i32_0 = arith.constant 0 : i32
    %c0_i32_1 = arith.constant 0 : i32
    return %c0_i32, %c0_i32_0 : i32, i32
  }
  func.func @transform_5(%arg0: i32) -> (i32, i32) {
    %c0_i32 = arith.constant 0 : i32
    %c0_i32_0 = arith.constant 0 : i32
    %c0_i32_1 = arith.constant 0 : i32
    return %c0_i32, %c0_i32_0 : i32, i32
  }
  func.func @transform_6(%arg0: i32) -> (i32, i32) {
    %c0_i32 = arith.constant 0 : i32
    %c0_i32_0 = arith.constant 0 : i32
    %c0_i32_1 = arith.constant 0 : i32
    return %c0_i32, %c0_i32_0 : i32, i32
  }
  func.func @transform_7(%arg0: i32) -> (i32, i32, i32) {
    %c0_i32 = arith.constant 0 : i32
    %c0_i32_0 = arith.constant 0 : i32
    %c0_i32_1 = arith.constant 0 : i32
    return %arg0, %c0_i32, %c0_i32_0 : i32, i32, i32
  }
}

</mosaic_0001>

<bundles_post_ra>
// kernel: tpu_custom_call.1
= control target key start
LH: loop header
LB: loop body
LE: loop exit
PB: predicated region body
PF: predicated region fallthrough
CT: control target
= control target key end

     0   :  { %s3483_s0 = inlined_call_operand.vmem [shape: f32[2,8,256], index: 0, kind: input, shape index: {}]   ;;  %s3484_s1 = inlined_call_operand.vmem [shape: f32[384,8], index: 1, kind: input, shape index: {}]   ;;  %s3485_s2 = inlined_call_operand.vmem [shape: f32[8,128], index: 2, kind: input, shape index: {}]   ;;  %s3486_s3 = inlined_call_operand.vmem [shape: f32[8,1], index: 3, kind: input, shape index: {}]   ;;  %s3487_s4 = inlined_call_operand.vmem [shape: f32[8,1], index: 4, kind: input, shape index: {}]   ;;  %s3488_s5 = inlined_call_operand.vmem [shape: f32[8,1], index: 5, kind: input, shape index: {}]   ;;  %s3489_s6 = inlined_call_operand.vmem [shape: f32[128,128], index: 6, kind: input, shape index: {}]   ;;  %s3490_s7 = inlined_call_operand.hbm [shape: f32[2,8,256], index: 7, kind: output, shape index: {}]  }
   0x1   :  { %3538 = sst [smem:[#allocation49_spill]] %s3483_s0 }
   0x2   :  { %3539 = sst [smem:[#allocation50_spill]] %s3484_s1 }
   0x3   :  { %3540 = sst [smem:[#allocation51_spill]] %s3485_s2 }
   0x4   :  { %3541 = sst [smem:[#allocation52_spill]] %s3486_s3 }
   0x5   :  { %12 = vsyncpa [#allocation3], 0 }
   0x6   :  { %14 = vsyncpa [#allocation3 + $0x1], 0  ;;  %s2300_s24 = smov 0   ;;  %s2302_s25 = smov 0  }
   0x7   :  { %s2304_s26 = smov 0   ;;  %s2306_s27 = smov 0  }
   0x8 LB: > { %s2321_s28 = sadd.s32 4294967295, %s2252_s27   ;;  %s1816_s29 = sadd.s32 4294967294, %s2252_s27   ;;  %s2252_s27 = sphi %s2306_s27, %s3672_s27   ;;  %s2248_s26 = sphi %s2304_s26, %s3671_s26   ;;  %s2244_s25 = sphi %s2302_s25, %s3670_s25   ;;  %s2240_s24 = sphi %s2300_s24, %s3669_s24  }
   0x9   : > { %s2325_s30 = sadd.s32 1, %s2252_s27   ;;  %s179_s8 = sadd.s32 1, %s2248_s26 }
   0xa   : > { %s176_s9 = ssub.s32 %s2252_s27, %s2325_s30  ;;  %p189_p0 = scmp.ne.s32.totalorder %s2248_s26, %s2244_s25 }
   0xb   : > { %p177_p1 = scmp.eq.s32.totalorder %s176_s9, 0  ;;  %p190_p2 = scmp.eq.s32.totalorder %s2321_s28, 1 }
   0xc   : > { %p195_p3 = scmp.ne.s32.totalorder %s2244_s25, %s2240_s24  ;;  %p196_p4 = scmp.eq.s32.totalorder %s1816_s29, 1 }
   0xd   : > { %s2336_s10 = scalar_select %p177_p1, %s2248_s26, %s179_s8  }
   0xe   : > { %p2338_p5 = por %p190_p2, %p189_p0  ;;  %p2342_p6 = por %p196_p4, %p195_p3 }
   0xf   : > { %p1819_p7 = scmp.ge.s32.totalorder %s2252_s27, 1  ;;  %p240_p8 = scmp.lt.s32.totalorder %s2252_s27, 3 }
  0x11   : > { %p241_p9 = pnand %p1819_p7, %p240_p8 }
  0x13   : > { %244 = sbr.rel (%p241_p9) target bundleno = 1987 (0x7c3), region = 48 }
  0x1a   : > { %p272_p10 = scmp.lt.s32.totalorder %s2321_s28, 1  ;;  %v3491_v0 = vmov 0.0   ;;  %s3544_s0 = sld [smem:[#allocation49_spill]]  ;;  %vm328_vm0 = vcmask 64512   ;;  %vm2256_vm1 = vmmov 0   ;;  %vm1648_vm2 = vcmask 7168  }
  0x1b   : > { %537 = vmatprep.mubr.f32.mxu0 %v3491_v0  ;;  %s3545_s1 = sld [smem:[#allocation50_spill]]  ;;  %s3619_s2 = sld [smem:[#allocation51_spill]] }
  0x1c   : > { %s273_s13 = scalar_select %p272_p10, %s2321_s28, 1 }
  0x1d   : > { %s3668_s3 = sld [smem:[#allocation52_spill]] }
  0x1e   : > { %s1876_s14 = sshll.u32 %s273_s13, 4 }
  0x20   : > { %s276_s17 = scalar_lea.vmem %s3544_s0, %s1876_s14 }
  0x21   : > { %v327_v1 = vld [vmem:[%s276_s17 + $0x8] sm:$0xff]  ;;  %v326_v2 = vld [vmem:[%s276_s17] sm:$0xff]  ;;  %v280_v5 = vld [vmem:[%s3545_s1 + $0x10] sm:$0xff] }
  0x22   : > { %v278_v3 = vld [vmem:[%s3545_s1] sm:$0xff]  ;;  %473 = vmatprep.subr.mxu0 %v327_v1  ;;  %v279_v4 = vld [vmem:[%s3545_s1 + $0x8] sm:$0xff]  ;;  %v281_v6 = vld [vmem:[%s3545_s1 + $0x18] sm:$0xff] }
  0x23   : > { %474 = vmatpush1.msra.mxu0 %v326_v2  ;;  %v282_v7 = vld [vmem:[%s3545_s1 + $0x20] sm:$0xff]  ;;  %v283_v8 = vld [vmem:[%s3545_s1 + $0x28] sm:$0xff]  ;;  %v284_v9 = vld [vmem:[%s3545_s1 + $0x30] sm:$0xff] }
  0x24   : > { %1823 = vmatmul.mubr.msk.f32.vlgmr.msra.gmra.mrb[0].mxu0 %vm328_vm0, %v278_v3  ;;  %v285_v10 = vld [vmem:[%s3545_s1 + $0x38] sm:$0xff]  ;;  %v286_v11 = vld [vmem:[%s3545_s1 + $0x40] sm:$0xff]  ;;  %v287_v12 = vld [vmem:[%s3545_s1 + $0x48] sm:$0xff] }
  0x25   : > { %543 = vmatprep.mubr.f32.mxu0 %v3491_v0  ;;  %v288_v13 = vld [vmem:[%s3545_s1 + $0x50] sm:$0xff]  ;;  %v289_v14 = vld [vmem:[%s3545_s1 + $0x58] sm:$0xff]  ;;  %v290_v15 = vld [vmem:[%s3545_s1 + $0x60] sm:$0xff] }
  0x26   : > { %v291_v16 = vld [vmem:[%s3545_s1 + $0x68] sm:$0xff]  ;;  %v292_v17 = vld [vmem:[%s3545_s1 + $0x70] sm:$0xff]  ;;  %v293_v18 = vld [vmem:[%s3545_s1 + $0x78] sm:$0xff] }
  0x27   : > { %v294_v19 = vld [vmem:[%s3545_s1 + $0x80] sm:$0xff]  ;;  %v295_v20 = vld [vmem:[%s3545_s1 + $0x88] sm:$0xff]  ;;  %v296_v21 = vld [vmem:[%s3545_s1 + $0x90] sm:$0xff] }
  0x28   : > { %1824 = vmatmul.mubr.msk.f32.gmra.mrb[2].mxu0 %vm328_vm0, %v279_v4  ;;  %v297_v22 = vld [vmem:[%s3545_s1 + $0x98] sm:$0xff]  ;;  %v298_v23 = vld [vmem:[%s3545_s1 + $0xa0] sm:$0xff]  ;;  %v299_v24 = vld [vmem:[%s3545_s1 + $0xa8] sm:$0xff] }
  0x29   : > { %549 = vmatprep.mubr.f32.mxu0 %v3491_v0  ;;  %v300_v25 = vld [vmem:[%s3545_s1 + $0xb0] sm:$0xff]  ;;  %v301_v26 = vld [vmem:[%s3545_s1 + $0xb8] sm:$0xff]  ;;  %v302_v27 = vld [vmem:[%s3545_s1 + $0xc0] sm:$0xff] }
  0x2a   : > { %v303_v28 = vld [vmem:[%s3545_s1 + $0xc8] sm:$0xff]  ;;  %v304_v29 = vld [vmem:[%s3545_s1 + $0xd0] sm:$0xff]  ;;  %v305_v30 = vld [vmem:[%s3545_s1 + $0xd8] sm:$0xff] }
  0x2b   : > { %v306_v31 = vld [vmem:[%s3545_s1 + $0xe0] sm:$0xff]  ;;  %v307_v32 = vld [vmem:[%s3545_s1 + $0xe8] sm:$0xff]  ;;  %v308_v33 = vld [vmem:[%s3545_s1 + $0xf0] sm:$0xff] }
  0x2c   : > { %1825 = vmatmul.mubr.msk.f32.gmra.mrb[4].mxu0 %vm328_vm0, %v280_v5  ;;  %v309_v34 = vld [vmem:[%s3545_s1 + $0xf8] sm:$0xff] }
  0x2d   : > { %555 = vmatprep.mubr.f32.mxu0 %v3491_v0 }
  0x30   : > { %1826 = vmatmul.mubr.msk.f32.gmra.mrb[6].mxu0 %vm328_vm0, %v281_v6 }
  0x31   : > { %561 = vmatprep.mubr.f32.mxu0 %v3491_v0 }
  0x34   : > { %1827 = vmatmul.mubr.msk.f32.gmra.mrb[8].mxu0 %vm328_vm0, %v282_v7 }
  0x35   : > { %567 = vmatprep.mubr.f32.mxu0 %v3491_v0 }
  0x38   : > { %1828 = vmatmul.mubr.msk.f32.gmra.mrb[10].mxu0 %vm328_vm0, %v283_v8 }
  0x39   : > { %573 = vmatprep.mubr.f32.mxu0 %v3491_v0 }
  0x3c   : > { %1829 = vmatmul.mubr.msk.f32.gmra.mrb[12].mxu0 %vm328_vm0, %v284_v9 }
  0x3d   : > { %579 = vmatprep.mubr.f32.mxu0 %v3491_v0 }
  0x40   : > { %1830 = vmatmul.mubr.msk.f32.gmra.mrb[14].mxu0 %vm328_vm0, %v285_v10 }
  0x41   : > { %585 = vmatprep.mubr.f32.mxu0 %v3491_v0 }
  0x44   : > { %1831 = vmatmul.mubr.msk.f32.gmra.mrb[16].mxu0 %vm328_vm0, %v286_v11 }
  0x45   : > { %591 = vmatprep.mubr.f32.mxu0 %v3491_v0 }
  0x48   : > { %1832 = vmatmul.mubr.msk.f32.gmra.mrb[18].mxu0 %vm328_vm0, %v287_v12 }
  0x49   : > { %597 = vmatprep.mubr.f32.mxu0 %v3491_v0 }
  0x4c   : > { %1833 = vmatmul.mubr.msk.f32.gmra.mrb[20].mxu0 %vm328_vm0, %v288_v13 }
  0x4d   : > { %603 = vmatprep.mubr.f32.mxu0 %v3491_v0 }
  0x50   : > { %1834 = vmatmul.mubr.msk.f32.gmra.mrb[22].mxu0 %vm328_vm0, %v289_v14 }
  0x51   : > { %609 = vmatprep.mubr.f32.mxu0 %v3491_v0 }
  0x54   : > { %1835 = vmatmul.mubr.msk.f32.gmra.mrb[24].mxu0 %vm328_vm0, %v290_v15 }
  0x55   : > { %615 = vmatprep.mubr.f32.mxu0 %v3491_v0 }
  0x58   : > { %1836 = vmatmul.mubr.msk.f32.gmra.mrb[26].mxu0 %vm328_vm0, %v291_v16 }
  0x59   : > { %621 = vmatprep.mubr.f32.mxu0 %v3491_v0 }
  0x5c   : > { %1837 = vmatmul.mubr.msk.f32.gmra.mrb[28].mxu0 %vm328_vm0, %v292_v17 }
  0x5d   : > { %627 = vmatprep.mubr.f32.mxu0 %v3491_v0 }
  0x60   : > { %1838 = vmatmul.mubr.msk.f32.gmra.mrb[30].mxu0 %vm328_vm0, %v293_v18 }
  0x61   : > { %633 = vmatprep.mubr.f32.mxu0 %v3491_v0 }
  0x64   : > { %1839 = vmatmul.mubr.msk.f32.gmra.mrb[32].mxu0 %vm328_vm0, %v294_v19 }
  0x65   : > { %639 = vmatprep.mubr.f32.mxu0 %v3491_v0 }
  0x68   : > { %1840 = vmatmul.mubr.msk.f32.gmra.mrb[34].mxu0 %vm328_vm0, %v295_v20 }
  0x69   : > { %645 = vmatprep.mubr.f32.mxu0 %v3491_v0 }
  0x6c   : > { %1841 = vmatmul.mubr.msk.f32.gmra.mrb[36].mxu0 %vm328_vm0, %v296_v21 }
  0x6d   : > { %651 = vmatprep.mubr.f32.mxu0 %v3491_v0 }
  0x70   : > { %1842 = vmatmul.mubr.msk.f32.gmra.mrb[38].mxu0 %vm328_vm0, %v297_v22 }
  0x71   : > { %657 = vmatprep.mubr.f32.mxu0 %v3491_v0 }
  0x74   : > { %1843 = vmatmul.mubr.msk.f32.gmra.mrb[40].mxu0 %vm328_vm0, %v298_v23 }
  0x75   : > { %663 = vmatprep.mubr.f32.mxu0 %v3491_v0 }
  0x78   : > { %1844 = vmatmul.mubr.msk.f32.gmra.mrb[42].mxu0 %vm328_vm0, %v299_v24 }
  0x79   : > { %669 = vmatprep.mubr.f32.mxu0 %v3491_v0 }
  0x7c   : > { %1845 = vmatmul.mubr.msk.f32.gmra.mrb[44].mxu0 %vm328_vm0, %v300_v25 }
  0x7d   : > { %675 = vmatprep.mubr.f32.mxu0 %v3491_v0 }
  0x80   : > { %1846 = vmatmul.mubr.msk.f32.gmra.mrb[46].mxu0 %vm328_vm0, %v301_v26 }
  0x81   : > { %681 = vmatprep.mubr.f32.mxu0 %v3491_v0 }
  0x84   : > { %1847 = vmatmul.mubr.msk.f32.gmra.mrb[48].mxu0 %vm328_vm0, %v302_v27 }
  0x85   : > { %687 = vmatprep.mubr.f32.mxu0 %v3491_v0 }
  0x88   : > { %1848 = vmatmul.mubr.msk.f32.gmra.mrb[50].mxu0 %vm328_vm0, %v303_v28 }
  0x89   : > { %693 = vmatprep.mubr.f32.mxu0 %v3491_v0 }
  0x8c   : > { %1849 = vmatmul.mubr.msk.f32.gmra.mrb[52].mxu0 %vm328_vm0, %v304_v29 }
  0x8d   : > { %699 = vmatprep.mubr.f32.mxu0 %v3491_v0 }
  0x90   : > { %1850 = vmatmul.mubr.msk.f32.gmra.mrb[54].mxu0 %vm328_vm0, %v305_v30 }
  0x91   : > { %705 = vmatprep.mubr.f32.mxu0 %v3491_v0 }
  0x94   : > { %1851 = vmatmul.mubr.msk.f32.gmra.mrb[56].mxu0 %vm328_vm0, %v306_v31 }
  0x95   : > { %711 = vmatprep.mubr.f32.mxu0 %v3491_v0 }
  0x98   : > { %1852 = vmatmul.mubr.msk.f32.gmra.mrb[58].mxu0 %vm328_vm0, %v307_v32 }
  0x99   : > { %717 = vmatprep.mubr.f32.mxu0 %v3491_v0 }
  0x9c   : > { %1853 = vmatmul.mubr.msk.f32.gmra.mrb[60].mxu0 %vm328_vm0, %v308_v33 }
  0x9d   : > { %723 = vmatprep.mubr.f32.mxu0 %v3491_v0 }
  0xa0   : > { %1854 = vmatmul.mubr.msk.f32.gmra.mrb[62].mxu0 %vm328_vm0, %v309_v34 }
  0xa1   : > { %729 = vmatprep.mubr.f32.mxu0 %v3491_v0 }
  0xf7   : > { %v539_v35 = vpop.f32.mrb[0].mxu0 }
  0xf8   : > { %v541_v36 = vpop.f32.mrb[1].mxu0 }
  0xfb   : > { %v545_v37 = vpop.f32.mrb[2].mxu0 }
  0xfc   : > { %v1066_v38 = vmax.f32 %v539_v35, %v545_v37  ;;  %v547_v39 = vpop.f32.mrb[3].mxu0 }
  0xfd   : > { %v1075_v40 = vmax.f32 %v541_v36, %v547_v39 }
  0xff   : > { %v551_v41 = vpop.f32.mrb[4].mxu0 }
 0x100   : > { %v1067_v42 = vmax.f32 %v1066_v38, %v551_v41  ;;  %v553_v43 = vpop.f32.mrb[5].mxu0 }
 0x101   : > { %v1076_v44 = vmax.f32 %v1075_v40, %v553_v43 }
 0x103   : > { %v557_v45 = vpop.f32.mrb[6].mxu0 }
 0x104   : > { %v1068_v46 = vmax.f32 %v1067_v42, %v557_v45  ;;  %v559_v47 = vpop.f32.mrb[7].mxu0 }
 0x105   : > { %v1077_v48 = vmax.f32 %v1076_v44, %v559_v47 }
 0x106   : > { %v1069_v49 = vrot.slane %v1068_v46, 4 }
 0x107   : > { %v1078_v50 = vrot.slane %v1077_v48, 4  ;;  %v2514_v51 = vpop.f32.mrb[8].mxu0 }
 0x108   : > { %v1070_v52 = vmax.f32 %v1068_v46, %v1069_v49  ;;  %v2516_v53 = vpop.f32.mrb[9].mxu0 }
 0x109   : > { %v1079_v54 = vmax.f32 %v1077_v48, %v1078_v50 }
 0x10a   : > { %v1071_v55 = vrot.slane %v1070_v52, 2 }
 0x10b   : > { %v1080_v56 = vrot.slane %v1079_v54, 2  ;;  %v2518_v57 = vpop.f32.mrb[10].mxu0 }
 0x10c   : > { %v1072_v58 = vmax.f32 %v1070_v52, %v1071_v55  ;;  %v1084_v59 = vmax.f32 %v2514_v51, %v2518_v57  ;;  %v2522_v60 = vpop.f32.mrb[11].mxu0 }
 0x10d   : > { %v1081_v61 = vmax.f32 %v1079_v54, %v1080_v56  ;;  %v1093_v62 = vmax.f32 %v2516_v53, %v2522_v60 }
 0x10e   : > { %v1073_v63 = vrot.slane %v1072_v58, 1 }
 0x10f   : > { %v1082_v1 = vrot.slane %v1081_v61, 1  ;;  %v2526_v2 = vpop.f32.mrb[12].mxu0 }
 0x110   : > { %v1074_v3 = vmax.f32 %v1072_v58, %v1073_v63  ;;  %v1085_v4 = vmax.f32 %v1084_v59, %v2526_v2  ;;  %v2529_v5 = vpop.f32.mrb[13].mxu0 }
 0x111   : > { %v1083_v6 = vmax.f32 %v1081_v61, %v1082_v1  ;;  %v1094_v7 = vmax.f32 %v1093_v62, %v2529_v5 }
 0x112   : > { %v1138_v8 = vsub.f32 %v539_v35, %v1074_v3  ;;  %v1140_v9 = vsub.f32 %v545_v37, %v1074_v3  ;;  %v1142_v10 = vsub.f32 %v551_v41, %v1074_v3  ;;  %v1144_v11 = vsub.f32 %v557_v45, %v1074_v3 }
 0x113   : > { %v1139_v12 = vsub.f32 %v541_v36, %v1083_v6  ;;  %v1141_v13 = vsub.f32 %v547_v39, %v1083_v6  ;;  %v1143_v14 = vsub.f32 %v553_v43, %v1083_v6  ;;  %v1145_v15 = vsub.f32 %v559_v47, %v1083_v6  ;;  %v581_v16 = vpop.f32.mrb[14].mxu0 }
 0x114   : > { %v1170_v17 = vmul.f32 1.442695, %v1138_v8  ;;  %v1174_v18 = vmul.f32 1.442695, %v1140_v9  ;;  %v1178_v19 = vmul.f32 1.442695, %v1142_v10  ;;  %v1086_v20 = vmax.f32 %v1085_v4, %v581_v16 }
 0x115   : > { %v1182_v21 = vmul.f32 1.442695, %v1144_v11  ;;  %v1172_v22 = vmul.f32 1.442695, %v1139_v12  ;;  %v2532_v24 = vpop.f32.mrb[15].mxu0 }
 0x116   : > { %2012 = vpow2.f32 %v1170_v17  ;;  %v1087_v23 = vrot.slane %v1086_v20, 4  ;;  %v1176_v25 = vmul.f32 1.442695, %v1141_v13  ;;  %v1095_v26 = vmax.f32 %v1094_v7, %v2532_v24 }
 0x117   : > { %2014 = vpow2.f32 %v1174_v18  ;;  %v2535_v27 = vpop.f32.mrb[16].mxu0  ;;  %v1180_v30 = vmul.f32 1.442695, %v1143_v14  ;;  %v1184_v33 = vmul.f32 1.442695, %v1145_v15 }
 0x118   : > { %2016 = vpow2.f32 %v1178_v19  ;;  %v1088_v28 = vmax.f32 %v1086_v20, %v1087_v23  ;;  %v2537_v29 = vpop.f32.mrb[17].mxu0  ;;  %v1096_v31 = vrot.slane %v1095_v26, 4 }
 0x119   : > { %2018 = vpow2.f32 %v1182_v21 }
 0x11a   : > { %2020 = vpow2.f32 %v1172_v22  ;;  %v1089_v32 = vrot.slane %v1088_v28, 2  ;;  %v1097_v34 = vmax.f32 %v1095_v26, %v1096_v31 }
 0x11b   : > { %2022 = vpow2.f32 %v1176_v25  ;;  %v2539_v35 = vpop.f32.mrb[18].mxu0 }
 0x11c   : > { %v1090_v36 = vmax.f32 %v1088_v28, %v1089_v32  ;;  %v1102_v37 = vmax.f32 %v2535_v27, %v2539_v35  ;;  %v2543_v38 = vpop.f32.mrb[19].mxu0  ;;  %2024 = vpow2.f32 %v1180_v30  ;;  %v1098_v39 = vrot.slane %v1097_v34, 2 }
 0x11d   : > { %v1111_v40 = vmax.f32 %v2537_v29, %v2543_v38  ;;  %2026 = vpow2.f32 %v1184_v33 }
 0x11e   : > { %v1091_v41 = vrot.slane %v1090_v36, 1  ;;  %v1099_v42 = vmax.f32 %v1097_v34, %v1098_v39 }
 0x11f   : > { %v2547_v43 = vpop.f32.mrb[20].mxu0 }
 0x120   : > { %v2549_v44 = vpop.eup %2012  ;;  %v1092_v45 = vmax.f32 %v1090_v36, %v1091_v41  ;;  %v1103_v46 = vmax.f32 %v1102_v37, %v2547_v43  ;;  %v2552_v47 = vpop.f32.mrb[21].mxu0  ;;  %v1100_v49 = vrot.slane %v1099_v42, 1 }
 0x121   : > { %v2554_v48 = vpop.eup %2014  ;;  %v1112_v50 = vmax.f32 %v1111_v40, %v2552_v47 }
 0x122   : > { %v2557_v52 = vpop.eup %2016  ;;  %v1234_v54 = vadd.f32 %v2554_v48, %v2549_v44  ;;  %v1146_v55 = vsub.f32 %v2514_v51, %v1092_v45  ;;  %v1148_v56 = vsub.f32 %v2518_v57, %v1092_v45  ;;  %v1150_v58 = vsub.f32 %v2526_v2, %v1092_v45 }
 0x123   : > { %v2564_v59 = vpop.eup %2018  ;;  %v1152_v61 = vsub.f32 %v581_v16, %v1092_v45  ;;  %v1101_v62 = vmax.f32 %v1099_v42, %v1100_v49  ;;  %v2566_v63 = vpop.f32.mrb[22].mxu0 }
 0x124   : > { %v2568_v1 = vpop.eup %2020  ;;  %v1235_v3 = vadd.f32 %v2557_v52, %v1234_v54  ;;  %v1186_v4 = vmul.f32 1.442695, %v1146_v55  ;;  %v1190_v6 = vmul.f32 1.442695, %v1148_v56  ;;  %v1194_v7 = vmul.f32 1.442695, %v1150_v58 }
 0x125   : > { %v2571_v8 = vpop.eup %2022  ;;  %v1198_v51 = vmul.f32 1.442695, %v1152_v61  ;;  %v1147_v57 = vsub.f32 %v2516_v53, %v1101_v62  ;;  %v1149_v2 = vsub.f32 %v2522_v60, %v1101_v62  ;;  %v1151_v9 = vsub.f32 %v2529_v5, %v1101_v62  ;;  %v2576_v10 = vpop.f32.mrb[23].mxu0 }
 0x126   : > { %v1236_v11 = vadd.f32 %v2564_v59, %v1235_v3  ;;  %v1243_v12 = vadd.f32 %v2571_v8, %v2568_v1  ;;  %2028 = vpow2.f32 %v1186_v4  ;;  %v1153_v13 = vsub.f32 %v2532_v24, %v1101_v62  ;;  %v2582_v14 = vpop.eup %2024 }
 0x127   : > { %2030 = vpow2.f32 %v1190_v6  ;;  %v1188_v15 = vmul.f32 1.442695, %v1147_v57  ;;  %v1192_v16 = vmul.f32 1.442695, %v1149_v2  ;;  %v2585_v5 = vpop.f32.mrb[24].mxu0  ;;  %v2587_v17 = vpop.eup %2026  ;;  %v1104_v19 = vmax.f32 %v1103_v46, %v2566_v63 }
 0x128   : > { %v1237_v53 = vrot.slane %v1236_v11, 4  ;;  %v1244_v60 = vadd.f32 %v2582_v14, %v1243_v12  ;;  %2032 = vpow2.f32 %v1194_v7  ;;  %v1196_v18 = vmul.f32 1.442695, %v1151_v9  ;;  %v2591_v21 = vpop.f32.mrb[25].mxu0 }
 0x129   : > { %2034 = vpow2.f32 %v1198_v51  ;;  %v1113_v20 = vmax.f32 %v1112_v50, %v2576_v10  ;;  %v1200_v24 = vmul.f32 1.442695, %v1153_v13  ;;  %v1105_v25 = vrot.slane %v1104_v19, 4 }
 0x12a   : > { %v1238_v22 = vadd.f32 %v1237_v53, %v1236_v11  ;;  %v1245_v23 = vadd.f32 %v2587_v17, %v1244_v60  ;;  %2036 = vpow2.f32 %v1188_v15 }
 0x12b   : > { %2038 = vpow2.f32 %v1192_v16  ;;  %v1114_v26 = vrot.slane %v1113_v20, 4  ;;  %v2594_v28 = vpop.f32.mrb[26].mxu0  ;;  %v1106_v34 = vmax.f32 %v1104_v19, %v1105_v25 }
 0x12c   : > { %v1239_v30 = vrot.slane %v1238_v22, 2  ;;  %v1246_v31 = vrot.slane %v1245_v23, 4  ;;  %v1120_v32 = vmax.f32 %v2585_v5, %v2594_v28  ;;  %v2598_v33 = vpop.f32.mrb[27].mxu0  ;;  %2040 = vpow2.f32 %v1196_v18 }
 0x12d   : > { %v1115_v36 = vmax.f32 %v1113_v20, %v1114_v26  ;;  %v1129_v37 = vmax.f32 %v2591_v21, %v2598_v33  ;;  %2042 = vpow2.f32 %v1200_v24  ;;  %v1107_v41 = vrot.slane %v1106_v34, 2 }
 0x12e   : > { %v1240_v39 = vadd.f32 %v1239_v30, %v1238_v22  ;;  %v1247_v40 = vadd.f32 %v1246_v31, %v1245_v23 }
 0x12f   : > { %v1116_v42 = vrot.slane %v1115_v36, 2  ;;  %v2602_v45 = vpop.f32.mrb[28].mxu0  ;;  %v1108_v58 = vmax.f32 %v1106_v34, %v1107_v41 }
 0x130   : > { %v2604_v46 = vpop.eup %2028  ;;  %v1241_v49 = vrot.slane %v1240_v39, 1  ;;  %v1248_v50 = vrot.slane %v1247_v40, 2  ;;  %v1121_v54 = vmax.f32 %v1120_v32, %v2602_v45  ;;  %v2607_v55 = vpop.f32.mrb[29].mxu0 }
 0x131   : > { %v2609_v56 = vpop.eup %2030  ;;  %v1117_v61 = vmax.f32 %v1115_v36, %v1116_v42  ;;  %v1130_v62 = vmax.f32 %v1129_v37, %v2607_v55  ;;  %v1109_v57 = vrot.slane %v1108_v58, 1 }
 0x132   : > { %v2612_v3 = vpop.eup %2032  ;;  %v1242_v4 = vadd.f32 %v1241_v49, %v1240_v39  ;;  %v1249_v6 = vadd.f32 %v1248_v50, %v1247_v40  ;;  %v1252_v7 = vadd.f32 %v2609_v56, %v2604_v46 }
 0x133   : > { %v2616_v51 = vpop.eup %2034  ;;  %v1118_v2 = vrot.slane %v1117_v61, 1  ;;  %v2618_v9 = vpop.f32.mrb[30].mxu0  ;;  %v1110_v60 = vmax.f32 %v1108_v58, %v1109_v57 }
 0x134   : > { %v2620_v11 = vpop.eup %2036  ;;  %v1253_v12 = vadd.f32 %v2612_v3, %v1252_v7  ;;  %v1122_v13 = vmax.f32 %v1121_v54, %v2618_v9  ;;  %v2624_v15 = vpop.f32.mrb[31].mxu0  ;;  %v1250_v16 = vrot.slane %v1249_v6, 1  ;;  %2044 = vrcp.f32 %v1242_v4 }
 0x135   : > { %v2626_v53 = vpop.eup %2038  ;;  %v1119_v18 = vmax.f32 %v1117_v61, %v1118_v2  ;;  %v1131_v19 = vmax.f32 %v1130_v62, %v2624_v15  ;;  %v1154_v26 = vsub.f32 %v2535_v27, %v1110_v60  ;;  %v1156_v30 = vsub.f32 %v2539_v35, %v1110_v60 }
 0x136   : > { %v1254_v20 = vadd.f32 %v2616_v51, %v1253_v12  ;;  %v1261_v22 = vadd.f32 %v2626_v53, %v2620_v11  ;;  %v1123_v23 = vrot.slane %v1122_v13, 4  ;;  %v1251_v24 = vadd.f32 %v1250_v16, %v1249_v6  ;;  %v2632_v25 = vpop.eup %2040 }
 0x137   : > { %v1158_v31 = vsub.f32 %v2547_v43, %v1110_v60  ;;  %v1160_v32 = vsub.f32 %v2566_v63, %v1110_v60  ;;  %v2638_v34 = vpop.f32.mrb[32].mxu0  ;;  %v1155_v39 = vsub.f32 %v2537_v29, %v1119_v18  ;;  %v1157_v40 = vsub.f32 %v2543_v38, %v1119_v18  ;;  %v2645_v42 = vpop.eup %2042 }
 0x138   : > { %v1255_v36 = vrot.slane %v1254_v20, 4  ;;  %v1262_v37 = vadd.f32 %v2632_v25, %v1261_v22  ;;  %v2643_v41 = vpop.f32.mrb[33].mxu0  ;;  %v1202_v27 = vmul.f32 1.442695, %v1154_v26  ;;  %v1206_v49 = vmul.f32 1.442695, %v1156_v30 }
 0x139   : > { %v1210_v35 = vmul.f32 1.442695, %v1158_v31  ;;  %v1159_v43 = vsub.f32 %v2552_v47, %v1119_v18  ;;  %v1214_v54 = vmul.f32 1.442695, %v1160_v32  ;;  %v1161_v58 = vsub.f32 %v2576_v10, %v1119_v18 }
 0x13a   : > { %v1256_v50 = vadd.f32 %v1255_v36, %v1254_v20  ;;  %v1263_v63 = vadd.f32 %v2645_v42, %v1262_v37  ;;  %2046 = vpow2.f32 %v1202_v27  ;;  %v1204_v61 = vmul.f32 1.442695, %v1155_v39 }
 0x13b   : > { %v1208_v29 = vmul.f32 1.442695, %v1157_v40  ;;  %v1212_v62 = vmul.f32 1.442695, %v1159_v43  ;;  %2048 = vpow2.f32 %v1206_v49  ;;  %v1216_v6 = vmul.f32 1.442695, %v1161_v58 }
 0x13c   : > { %v1257_v38 = vrot.slane %v1256_v50, 2  ;;  %v1264_v4 = vrot.slane %v1263_v63, 4  ;;  %v2650_v7 = vpop.f32.mrb[34].mxu0  ;;  %2050 = vpow2.f32 %v1210_v35  ;;  %v1124_v57 = vmax.f32 %v1122_v13, %v1123_v23 }
 0x13d   : > { %v1132_v2 = vrot.slane %v1131_v19, 4  ;;  %v826_v47 = vmax.f32 %v2638_v34, %v2643_v41  ;;  %v2654_v12 = vpop.f32.mrb[35].mxu0  ;;  %2052 = vpow2.f32 %v1214_v54 }
 0x13e   : > { %v2045_v16 = vpop.eup %2044  ;;  %v1258_v10 = vadd.f32 %v1257_v38, %v1256_v50  ;;  %v1265_v60 = vadd.f32 %v1264_v4, %v1263_v63  ;;  %v829_v18 = vmax.f32 %v2650_v7, %v2654_v12  ;;  %2054 = vpow2.f32 %v1204_v61 }
 0x13f   : > { %v1125_v20 = vrot.slane %v1124_v57, 2  ;;  %v1133_v22 = vmax.f32 %v1131_v19, %v1132_v2  ;;  %827 = vmax.xlane.f32.xlu0 %v826_v47  ;;  %v2658_v26 = vpop.f32.mrb[36].mxu0  ;;  %v1314_v13 = vmul.f32 0.17677669, %v2045_v16  ;;  %2056 = vpow2.f32 %v1208_v29 }
 0x140   : > { %v1259_v23 = vrot.slane %v1258_v10, 1  ;;  %v1266_v30 = vrot.slane %v1265_v60, 2  ;;  %v2660_v31 = vpop.f32.mrb[37].mxu0  ;;  %2058 = vpow2.f32 %v1212_v62 }
 0x141   : > { %v1126_v32 = vmax.f32 %v1124_v57, %v1125_v20  ;;  %v1134_v36 = vrot.slane %v1133_v22, 2  ;;  %v832_v37 = vmax.f32 %v2658_v26, %v2660_v31  ;;  %2060 = vpow2.f32 %v1216_v6 }
 0x142   : > { %v1260_v39 = vadd.f32 %v1259_v23, %v1258_v10  ;;  %v1267_v40 = vadd.f32 %v1266_v30, %v1265_v60  ;;  %v2665_v19 = vmul.f32 %v2549_v44, %v1314_v13  ;;  %2062 = vrcp.f32 %v1251_v24 }
 0x143   : > { %v1127_v27 = vrot.slane %v1126_v32, 1  ;;  %v1135_v49 = vmax.f32 %v1133_v22, %v1134_v36  ;;  %830 = vmax.xlane.f32.xlu0 %v829_v18  ;;  %833 = vmax.xlane.f32.xlu1 %v832_v37  ;;  %v2667_v35 = vpop.f32.mrb[38].mxu0  ;;  %v2670_v43 = vmul.f32 %v2554_v48, %v1314_v13  ;;  %v2675_v63 = vmul.f32 %v2557_v52, %v1314_v13 }
 0x144   : > { %3546 = vst [vmem:[#allocation5_spill] sm:$0xff] %v2665_v19  ;;  %v2672_v50 = vpop.f32.mrb[39].mxu0  ;;  %v2678_v54 = vmul.f32 %v2564_v59, %v1314_v13  ;;  %v1268_v44 = vrot.slane %v1267_v40, 1  ;;  %2064 = vrcp.f32 %v1260_v39  ;;  %v2680_v58 = vpop.eup %2046 }
 0x145   : > { %3547 = vst [vmem:[#allocation6_spill] sm:$0xff] %v2670_v43  ;;  %3548 = vst [vmem:[#allocation7_spill] sm:$0xff] %v2675_v63  ;;  %v1128_v61 = vmax.f32 %v1126_v32, %v1127_v27  ;;  %v1136_v29 = vrot.slane %v1135_v49, 1  ;;  %v835_v24 = vmax.f32 %v2667_v35, %v2672_v50  ;;  %v2686_v62 = vpop.eup %2048 }
 0x146   : > { %3549 = vst [vmem:[#allocation8_spill] sm:$0xff] %v2678_v54  ;;  %v1269_v38 = vadd.f32 %v1268_v44, %v1267_v40  ;;  %v2690_v59 = vpop.eup %2050  ;;  %v1270_v4 = vadd.f32 %v2686_v62, %v2680_v58 }
 0x147   : > { %v1162_v6 = vsub.f32 %v2585_v5, %v1128_v61  ;;  %v1164_v57 = vsub.f32 %v2594_v28, %v1128_v61  ;;  %v1166_v2 = vsub.f32 %v2602_v45, %v1128_v61  ;;  %836 = vmax.xlane.f32.xlu1 %v835_v24  ;;  %v2697_v47 = vpop.f32.mrb[40].mxu0  ;;  %v2699_v16 = vpop.eup %2052  ;;  %v1168_v10 = vsub.f32 %v2618_v9, %v1128_v61 }
 0x148   : > { %v1137_v60 = vmax.f32 %v1135_v49, %v1136_v29  ;;  %v2702_v18 = vpop.f32.mrb[41].mxu0  ;;  %2066 = vrcp.f32 %v1269_v38  ;;  %v2704_v20 = vpop.eup %2054  ;;  %v1271_v22 = vadd.f32 %v2690_v59, %v1270_v4 }
 0x149   : > { %v1218_v5 = vmul.f32 1.442695, %v1162_v6  ;;  %v1222_v13 = vmul.f32 1.442695, %v1164_v57  ;;  %v1226_v28 = vmul.f32 1.442695, %v1166_v2  ;;  %v2707_v23 = vpop.eup %2056 }
 0x14a   : > { %v1230_v45 = vmul.f32 1.442695, %v1168_v10  ;;  %v1163_v30 = vsub.f32 %v2591_v21, %v1137_v60  ;;  %v1165_v32 = vsub.f32 %v2598_v33, %v1137_v60  ;;  %v1167_v9 = vsub.f32 %v2607_v55, %v1137_v60  ;;  %v2712_v36 = vpop.eup %2058 }
 0x14b   : > { %v1272_v37 = vadd.f32 %v2699_v16, %v1271_v22  ;;  %v1279_v39 = vadd.f32 %v2707_v23, %v2704_v20  ;;  %2068 = vpow2.f32 %v1218_v5  ;;  %v1169_v40 = vsub.f32 %v2624_v15, %v1137_v60  ;;  %v2718_v27 = vpop.f32.mrb[42].mxu0  ;;  %v2720_v49 = vpop.eup %2060 }
 0x14c   : > { %2070 = vpow2.f32 %v1222_v13  ;;  %v1220_v21 = vmul.f32 1.442695, %v1163_v30  ;;  %v1224_v44 = vmul.f32 1.442695, %v1165_v32  ;;  %v1228_v33 = vmul.f32 1.442695, %v1167_v9  ;;  %v2063_v61 = vpop.eup %2062 }
 0x14d   : > { %v1273_v55 = vrot.slane %v1272_v37, 4  ;;  %v1280_v29 = vadd.f32 %v2712_v36, %v1279_v39  ;;  %2072 = vpow2.f32 %v1226_v28  ;;  %v1232_v24 = vmul.f32 1.442695, %v1169_v40  ;;  %v2723_v38 = vpop.f32.mrb[43].mxu0 }
 0x14e   : > { %v2065_v4 = vpop.eup %2064  ;;  %2074 = vpow2.f32 %v1230_v45  ;;  %v838_v15 = vmax.f32 %v2697_v47, %v2702_v18  ;;  %v841_v6 = vmax.f32 %v2718_v27, %v2723_v38  ;;  %v1315_v57 = vmul.f32 0.17677669, %v2063_v61 }
 0x14f   : > { %v1274_v2 = vadd.f32 %v1273_v55, %v1272_v37  ;;  %v1281_v10 = vadd.f32 %v2720_v49, %v1280_v29  ;;  %2076 = vpow2.f32 %v1220_v21  ;;  %v2730_v60 = vpop.f32.mrb[44].mxu0  ;;  %v1316_v22 = vmul.f32 0.17677669, %v2065_v4 }
 0x150   : > { %2078 = vpow2.f32 %v1224_v44  ;;  %839 = vmax.xlane.f32.xlu0 %v838_v15  ;;  %842 = vmax.xlane.f32.xlu1 %v841_v6  ;;  %v2732_v5 = vpop.f32.mrb[45].mxu0  ;;  %v2735_v13 = vmul.f32 %v2568_v1, %v1315_v57  ;;  %v2738_v28 = vmul.f32 %v2571_v8, %v1315_v57  ;;  %v2741_v45 = vmul.f32 %v2582_v14, %v1315_v57 }
 0x151   : > { %v1275_v30 = vrot.slane %v1274_v2, 2  ;;  %v1282_v32 = vrot.slane %v1281_v10, 4  ;;  %v844_v9 = vmax.f32 %v2730_v60, %v2732_v5  ;;  %2080 = vpow2.f32 %v1228_v33 }
 0x152   : > { %3550 = vst [vmem:[#allocation9_spill] sm:$0xff] %v2735_v13  ;;  %3551 = vst [vmem:[#allocation10_spill] sm:$0xff] %v2738_v28  ;;  %v2067_v37 = vpop.eup %2066  ;;  %v2748_v40 = vmul.f32 %v2587_v17, %v1315_v57  ;;  %v2751_v1 = vmul.f32 %v2604_v46, %v1316_v22  ;;  %v2756_v61 = vmul.f32 %v2609_v56, %v1316_v22  ;;  %2082 = vpow2.f32 %v1232_v24 }
 0x153   : > { %3552 = vst [vmem:[#allocation11_spill] sm:$0xff] %v2741_v45  ;;  %v1276_v8 = vadd.f32 %v1275_v30, %v1274_v2  ;;  %v1283_v21 = vadd.f32 %v1282_v32, %v1281_v10  ;;  %v2753_v14 = vpop.f32.mrb[46].mxu0  ;;  %v1317_v44 = vmul.f32 0.17677669, %v2067_v37  ;;  %v2763_v17 = vmul.f32 %v2612_v3, %v1316_v22 }
 0x154   : > { %3553 = vst [vmem:[#allocation12_spill] sm:$0xff] %v2748_v40  ;;  %3554 = vst [vmem:[#allocation13_spill] sm:$0xff] %v2751_v1  ;;  %845 = vmax.xlane.f32.xlu0 %v844_v9  ;;  %v2758_v33 = vpop.f32.mrb[47].mxu0  ;;  %v2766_v46 = vmul.f32 %v2616_v51, %v1316_v22 }
 0x155   : > { %3555 = vst [vmem:[#allocation14_spill] sm:$0xff] %v2756_v61  ;;  %3556 = vst [vmem:[#allocation15_spill] sm:$0xff] %v2763_v17  ;;  %v2768_v29 = vpop.eup %2068  ;;  %v1277_v4 = vrot.slane %v1276_v8, 1  ;;  %v1284_v15 = vrot.slane %v1283_v21, 2  ;;  %v847_v56 = vmax.f32 %v2753_v14, %v2758_v33  ;;  %v2773_v24 = vmul.f32 %v2620_v11, %v1317_v44 }
 0x156   : > { %3557 = vst [vmem:[#allocation16_spill] sm:$0xff] %v2766_v46  ;;  %v2775_v6 = vpop.eup %2070  ;;  %v2778_v57 = vmul.f32 %v2626_v53, %v1317_v44  ;;  %v2783_v51 = vmul.f32 %v2632_v25, %v1317_v44  ;;  %v2786_v2 = vmul.f32 %v2645_v42, %v1317_v44  ;;  %v3562_v61 = vmov 0.0  }
 0x157   : > { %3558 = vst [vmem:[#allocation17_spill] sm:$0xff] %v2773_v24  ;;  %v2788_v10 = vpop.eup %2072  ;;  %v1278_v22 = vadd.f32 %v1277_v4, %v1276_v8  ;;  %v1285_v30 = vadd.f32 %v1284_v15, %v1283_v21  ;;  %v1288_v11 = vadd.f32 %v2775_v6, %v2768_v29  ;;  %848 = vmax.xlane.f32.xlu1 %v847_v56  ;;  %v2792_v32 = vpop.f32.mrb[48].mxu0 }
 0x158   : > { %3559 = vst [vmem:[#allocation18_spill] sm:$0xff] %v2778_v57  ;;  %3560 = vst [vmem:[#allocation19_spill] sm:$0xff] %v2783_v51  ;;  %v2796_v9 = vpop.eup %2074  ;;  %v2798_v25 = vpop.f32.mrb[49].mxu0 }
 0x159   : > { %3561 = vst [vmem:[#allocation20_spill] sm:$0xff] %v2786_v2  ;;  %v2804_v8 = vpop.eup %2076  ;;  %v1289_v21 = vadd.f32 %v2788_v10, %v1288_v11  ;;  %v850_v44 = vmax.f32 %v2792_v32, %v2798_v25  ;;  %v1286_v4 = vrot.slane %v1285_v30, 1  ;;  %2084 = vrcp.f32 %v1278_v22 }
 0x15a   : > { %v2809_v15 = vpop.eup %2078 }
 0x15b   : > { %v1290_v56 = vadd.f32 %v2796_v9, %v1289_v21  ;;  %v1297_v53 = vadd.f32 %v2809_v15, %v2804_v8  ;;  %851 = vmax.xlane.f32.xlu0 %v850_v44  ;;  %v2814_v3 = vpop.f32.mrb[50].mxu0  ;;  %v1287_v37 = vadd.f32 %v1286_v4, %v1285_v30  ;;  %v2816_v42 = vpop.eup %2080 }
 0x15c   : > { %v2818_v52 = vpop.f32.mrb[51].mxu0  ;;  %v2823_v48 = vpop.eup %2082 }
 0x15d   : > { %v1291_v11 = vrot.slane %v1290_v56, 4  ;;  %v1298_v55 = vadd.f32 %v2816_v42, %v1297_v53  ;;  %v853_v22 = vmax.f32 %v2814_v3, %v2818_v52  ;;  %2086 = vrcp.f32 %v1287_v37 }
 0x15f   : > { %v1292_v21 = vadd.f32 %v1291_v11, %v1290_v56  ;;  %v1299_v39 = vadd.f32 %v2823_v48, %v1298_v55  ;;  %854 = vmax.xlane.f32.xlu1 %v853_v22  ;;  %v2826_v44 = vpop.f32.mrb[52].mxu0  ;;  %v310_v55 = vld [vmem:[%s3545_s1 + $0x100] sm:$0xff] }
 0x160   : > { %v2828_v30 = vpop.f32.mrb[53].mxu0  ;;  %1855 = vmatmul.mubr.msk.f32.gmra.mrb[64].mxu0 %vm328_vm0, %v310_v55 }
 0x161   : > { %v1293_v4 = vrot.slane %v1292_v21, 2  ;;  %v1300_v0 = vrot.slane %v1299_v39, 4  ;;  %v856_v17 = vmax.f32 %v2826_v44, %v2828_v30  ;;  %735 = vmatprep.mubr.f32.mxu0 %v3562_v61 }
 0x163   : > { %v2085_v53 = vpop.eup %2084  ;;  %v1294_v46 = vadd.f32 %v1293_v4, %v1292_v21  ;;  %v1301_v51 = vadd.f32 %v1300_v0, %v1299_v39  ;;  %857 = vmax.xlane.f32.xlu0 %v856_v17  ;;  %v2832_v37 = vpop.f32.mrb[54].mxu0  ;;  %v311_v0 = vld [vmem:[%s3545_s1 + $0x108] sm:$0xff] }
 0x164   : > { %v2837_v56 = vpop.f32.mrb[55].mxu0  ;;  %v1318_v11 = vmul.f32 0.17677669, %v2085_v53  ;;  %1856 = vmatmul.mubr.msk.f32.gmra.mrb[66].mxu0 %vm328_vm0, %v311_v0 }
 0x165   : > { %v1295_v22 = vrot.slane %v1294_v46, 1  ;;  %v1302_v2 = vrot.slane %v1301_v51, 2  ;;  %v859_v1 = vmax.f32 %v2832_v37, %v2837_v56  ;;  %741 = vmatprep.mubr.f32.mxu0 %v3562_v61 }
 0x166   : > { %v2847_v39 = vmul.f32 %v2680_v58, %v1318_v11  ;;  %v2850_v17 = vmul.f32 %v2686_v62, %v1318_v11  ;;  %v2853_v21 = vmul.f32 %v2690_v59, %v1318_v11  ;;  %v2856_v4 = vmul.f32 %v2699_v16, %v1318_v11 }
 0x167   : > { %v2087_v53 = vpop.eup %2086  ;;  %v1296_v55 = vadd.f32 %v1295_v22, %v1294_v46  ;;  %v1303_v24 = vadd.f32 %v1302_v2, %v1301_v51  ;;  %860 = vmax.xlane.f32.xlu1 %v859_v1  ;;  %v2858_v57 = vpop.f32.mrb[56].mxu0  ;;  %v312_v1 = vld [vmem:[%s3545_s1 + $0x110] sm:$0xff] }
 0x168   : > { %3563 = vst [vmem:[#allocation21_spill] sm:$0xff] %v2847_v39  ;;  %3564 = vst [vmem:[#allocation22_spill] sm:$0xff] %v2850_v17  ;;  %v2860_v63 = vpop.f32.mrb[57].mxu0  ;;  %v1319_v58 = vmul.f32 0.17677669, %v2087_v53  ;;  %1857 = vmatmul.mubr.msk.f32.gmra.mrb[68].mxu0 %vm328_vm0, %v312_v1 }
 0x169   : > { %3565 = vst [vmem:[#allocation23_spill] sm:$0xff] %v2853_v21  ;;  %3566 = vst [vmem:[#allocation24_spill] sm:$0xff] %v2856_v4  ;;  %v862_v16 = vmax.f32 %v2858_v57, %v2860_v63  ;;  %v1304_v46 = vrot.slane %v1303_v24, 1  ;;  %2088 = vrcp.f32 %v1296_v55  ;;  %747 = vmatprep.mubr.f32.mxu0 %v3562_v61 }
 0x16a   : > { %v2874_v51 = vmul.f32 %v2704_v20, %v1319_v58  ;;  %v2877_v2 = vmul.f32 %v2707_v23, %v1319_v58  ;;  %v2880_v11 = vmul.f32 %v2712_v36, %v1319_v58  ;;  %v2883_v22 = vmul.f32 %v2720_v49, %v1319_v58  ;;  %v313_v49 = vld [vmem:[%s3545_s1 + $0x118] sm:$0xff]  ;;  %v315_v23 = vld [vmem:[%s3545_s1 + $0x128] sm:$0xff] }
 0x16b   : > { %863 = vmax.xlane.f32.xlu0 %v862_v16  ;;  %v2885_v0 = vpop.f32.mrb[58].mxu0  ;;  %v1305_v53 = vadd.f32 %v1304_v46, %v1303_v24  ;;  %v314_v16 = vld [vmem:[%s3545_s1 + $0x120] sm:$0xff] }
 0x16c   : > { %3567 = vst [vmem:[#allocation25_spill] sm:$0xff] %v2874_v51  ;;  %3568 = vst [vmem:[#allocation26_spill] sm:$0xff] %v2877_v2  ;;  %v2887_v59 = vpop.f32.mrb[59].mxu0  ;;  %1858 = vmatmul.mubr.msk.f32.gmra.mrb[70].mxu0 %vm328_vm0, %v313_v49 }
 0x16d   : > { %3569 = vst [vmem:[#allocation27_spill] sm:$0xff] %v2880_v11  ;;  %3570 = vst [vmem:[#allocation28_spill] sm:$0xff] %v2883_v22  ;;  %v865_v36 = vmax.f32 %v2885_v0, %v2887_v59  ;;  %2090 = vrcp.f32 %v1305_v53  ;;  %753 = vmatprep.mubr.f32.mxu0 %v3562_v61 }
 0x16f   : > { %866 = vmax.xlane.f32.xlu1 %v865_v36  ;;  %v2900_v24 = vpop.f32.mrb[60].mxu0 }
 0x170   : > { %v2902_v55 = vpop.f32.mrb[61].mxu0  ;;  %1859 = vmatmul.mubr.msk.f32.gmra.mrb[72].mxu0 %vm328_vm0, %v314_v16 }
 0x171   : > { %v868_v58 = vmax.f32 %v2900_v24, %v2902_v55  ;;  %759 = vmatprep.mubr.f32.mxu0 %v3562_v61 }
 0x173   : > { %v2089_v1 = vpop.eup %2088  ;;  %869 = vmax.xlane.f32.xlu0 %v868_v58  ;;  %v2911_v46 = vpop.f32.mrb[62].mxu0 }
 0x174   : > { %v2913_v53 = vpop.f32.mrb[63].mxu0  ;;  %v1320_v36 = vmul.f32 0.17677669, %v2089_v1  ;;  %1860 = vmatmul.mubr.msk.f32.gmra.mrb[74].mxu0 %vm328_vm0, %v315_v23 }
 0x175   : > { %v871_v49 = vmax.f32 %v2911_v46, %v2913_v53  ;;  %765 = vmatprep.mubr.f32.mxu0 %v3562_v61 }
 0x176   : > { %v2923_v62 = vmul.f32 %v2768_v29, %v1320_v36  ;;  %v2926_v58 = vmul.f32 %v2775_v6, %v1320_v36  ;;  %v2929_v20 = vmul.f32 %v2788_v10, %v1320_v36  ;;  %v2932_v16 = vmul.f32 %v2796_v9, %v1320_v36  ;;  %v316_v6 = vld [vmem:[%s3545_s1 + $0x130] sm:$0xff] }
 0x177   : > { %v2091_v1 = vpop.eup %2090  ;;  %872 = vmax.xlane.f32.xlu1 %v871_v49 }
 0x178   : > { %3571 = vst [vmem:[#allocation29_spill] sm:$0xff] %v2923_v62  ;;  %3572 = vst [vmem:[#allocation30_spill] sm:$0xff] %v2926_v58  ;;  %v1321_v21 = vmul.f32 0.17677669, %v2091_v1  ;;  %1861 = vmatmul.mubr.msk.f32.gmra.mrb[76].mxu0 %vm328_vm0, %v316_v6  ;;  %v322_v6 = vld [vmem:[%s3545_s1 + $0x160] sm:$0xff] }
 0x179   : > { %3573 = vst [vmem:[#allocation31_spill] sm:$0xff] %v2929_v20  ;;  %3574 = vst [vmem:[#allocation32_spill] sm:$0xff] %v2932_v16  ;;  %771 = vmatprep.mubr.f32.mxu0 %v3562_v61 }
 0x17a   : > { %v2944_v10 = vmul.f32 %v2804_v8, %v1321_v21  ;;  %v2947_v9 = vmul.f32 %v2809_v15, %v1321_v21  ;;  %v2950_v23 = vmul.f32 %v2816_v42, %v1321_v21  ;;  %v2953_v36 = vmul.f32 %v2823_v48, %v1321_v21  ;;  %v317_v8 = vld [vmem:[%s3545_s1 + $0x138] sm:$0xff]  ;;  %v318_v48 = vld [vmem:[%s3545_s1 + $0x140] sm:$0xff]  ;;  %v319_v42 = vld [vmem:[%s3545_s1 + $0x148] sm:$0xff] }
 0x17b   : > { %v320_v15 = vld [vmem:[%s3545_s1 + $0x150] sm:$0xff]  ;;  %v321_v21 = vld [vmem:[%s3545_s1 + $0x158] sm:$0xff] }
 0x17c   : > { %3575 = vst [vmem:[#allocation33_spill] sm:$0xff] %v2944_v10  ;;  %3576 = vst [vmem:[#allocation34_spill] sm:$0xff] %v2947_v9  ;;  %1862 = vmatmul.mubr.msk.f32.gmra.mrb[78].mxu0 %vm328_vm0, %v317_v8  ;;  %v323_v8 = vld [vmem:[%s3545_s1 + $0x168] sm:$0xff] }
 0x17d   : > { %3577 = vst [vmem:[#allocation35_spill] sm:$0xff] %v2950_v23  ;;  %3578 = vst [vmem:[#allocation36_spill] sm:$0xff] %v2953_v36  ;;  %777 = vmatprep.mubr.f32.mxu0 %v3562_v61 }
 0x180   : > { %1863 = vmatmul.mubr.msk.f32.gmra.mrb[80].mxu0 %vm328_vm0, %v318_v48  ;;  %v324_v48 = vld [vmem:[%s3545_s1 + $0x170] sm:$0xff] }
 0x181   : > { %783 = vmatprep.mubr.f32.mxu0 %v3562_v61 }
 0x184   : > { %1864 = vmatmul.mubr.msk.f32.gmra.mrb[82].mxu0 %vm328_vm0, %v319_v42  ;;  %v325_v42 = vld [vmem:[%s3545_s1 + $0x178] sm:$0xff]  ;;  %s2258_s1 = smov 0.0  }
 0x185   : > { %789 = vmatprep.mubr.f32.mxu0 %v3562_v61 }
 0x188   : > { %1865 = vmatmul.mubr.msk.f32.gmra.mrb[84].mxu0 %vm328_vm0, %v320_v15 }
 0x189   : > { %795 = vmatprep.mubr.f32.mxu0 %v3562_v61 }
 0x18c   : > { %1866 = vmatmul.mubr.msk.f32.gmra.mrb[86].mxu0 %vm328_vm0, %v321_v21 }
 0x18d   : > { %801 = vmatprep.mubr.f32.mxu0 %v3562_v61 }
 0x190   : > { %1867 = vmatmul.mubr.msk.f32.gmra.mrb[88].mxu0 %vm328_vm0, %v322_v6 }
 0x191   : > { %807 = vmatprep.mubr.f32.mxu0 %v3562_v61 }
 0x194   : > { %1868 = vmatmul.mubr.msk.f32.gmra.mrb[90].mxu0 %vm328_vm0, %v323_v8 }
 0x195   : > { %813 = vmatprep.mubr.f32.mxu0 %v3562_v61 }
 0x198   : > { %1869 = vmatmul.mubr.msk.f32.gmra.mrb[92].mxu0 %vm328_vm0, %v324_v48 }
 0x199   : > { %819 = vmatprep.mubr.f32.mxu0 %v3562_v61 }
 0x19c   : > { %1870 = vmatmul.mubr.msk.f32.gmra.mrb[94].mxu0 %vm328_vm0, %v325_v42 }
 0x1cc   : > { %v828_v15 = vpop.xlane.xlu0 %827 }
 0x1cd   : > { %v874_v21 = vsub.f32 %v2638_v34, %v828_v15  ;;  %v875_v6 = vsub.f32 %v2643_v41, %v828_v15 }
 0x1cf   : > { %v906_v8 = vmul.f32 1.442695, %v874_v21  ;;  %v908_v29 = vmul.f32 1.442695, %v875_v6 }
 0x1d0   : > { %v831_v1 = vpop.xlane.xlu0 %830  ;;  %v834_v4 = vpop.xlane.xlu1 %833 }
 0x1d1   : > { %2092 = vpow2.f32 %v906_v8  ;;  %v876_v48 = vsub.f32 %v2650_v7, %v831_v1  ;;  %v877_v49 = vsub.f32 %v2654_v12, %v831_v1  ;;  %v878_v20 = vsub.f32 %v2658_v26, %v834_v4 }
 0x1d2   : > { %2094 = vpow2.f32 %v908_v29  ;;  %v879_v16 = vsub.f32 %v2660_v31, %v834_v4 }
 0x1d3   : > { %v910_v42 = vmul.f32 1.442695, %v876_v48  ;;  %v912_v23 = vmul.f32 1.442695, %v877_v49  ;;  %v914_v36 = vmul.f32 1.442695, %v878_v20 }
 0x1d4   : > { %v916_v34 = vmul.f32 1.442695, %v879_v16  ;;  %v837_v62 = vpop.xlane.xlu1 %836 }
 0x1d5   : > { %2096 = vpow2.f32 %v910_v42  ;;  %v880_v41 = vsub.f32 %v2667_v35, %v837_v62  ;;  %v881_v15 = vsub.f32 %v2672_v50, %v837_v62 }
 0x1d6   : > { %2098 = vpow2.f32 %v912_v23 }
 0x1d7   : > { %2100 = vpow2.f32 %v914_v36  ;;  %v918_v7 = vmul.f32 1.442695, %v880_v41  ;;  %v920_v21 = vmul.f32 1.442695, %v881_v15 }
 0x1d8   : > { %2102 = vpow2.f32 %v916_v34 }
 0x1d9   : > { %2104 = vpow2.f32 %v918_v7 }
 0x1da   : > { %2106 = vpow2.f32 %v920_v21 }
 0x1db   : > { %v3013_v12 = vpop.eup %2092 }
 0x1dc   : > { %v3015_v26 = vpop.eup %2094 }
 0x1dd   : > { %v840_v31 = vpop.xlane.xlu0 %839  ;;  %v970_v4 = vadd.f32 %v3015_v26, %v3013_v12  ;;  %v843_v20 = vpop.xlane.xlu1 %842 }
 0x1de   : > { %v882_v35 = vsub.f32 %v2697_v47, %v840_v31  ;;  %v883_v50 = vsub.f32 %v2702_v18, %v840_v31  ;;  %v884_v62 = vsub.f32 %v2718_v27, %v843_v20  ;;  %v885_v16 = vsub.f32 %v2723_v38, %v843_v20 }
 0x1df   : > { %v3023_v29 = vpop.eup %2096  ;;  %971 = vadd.xlane.f32.xlu0 %v970_v4 }
 0x1e0   : > { %v3025_v23 = vpop.eup %2098  ;;  %v922_v36 = vmul.f32 1.442695, %v882_v35  ;;  %v924_v49 = vmul.f32 1.442695, %v883_v50  ;;  %v926_v1 = vmul.f32 1.442695, %v884_v62 }
 0x1e1   : > { %v3027_v6 = vpop.eup %2100  ;;  %v928_v8 = vmul.f32 1.442695, %v885_v16  ;;  %v973_v47 = vadd.f32 %v3025_v23, %v3023_v29  ;;  %v846_v48 = vpop.xlane.xlu0 %845 }
 0x1e2   : > { %v3031_v18 = vpop.eup %2102  ;;  %2108 = vpow2.f32 %v922_v36  ;;  %v886_v27 = vsub.f32 %v2730_v60, %v846_v48  ;;  %v887_v38 = vsub.f32 %v2732_v5, %v846_v48 }
 0x1e3   : > { %v3035_v42 = vpop.eup %2104  ;;  %2110 = vpow2.f32 %v924_v49  ;;  %974 = vadd.xlane.f32.xlu1 %v973_v47  ;;  %v976_v34 = vadd.f32 %v3031_v18, %v3027_v6 }
 0x1e4   : > { %v3039_v41 = vpop.eup %2106  ;;  %2112 = vpow2.f32 %v926_v1  ;;  %v930_v15 = vmul.f32 1.442695, %v886_v27  ;;  %v932_v7 = vmul.f32 1.442695, %v887_v38  ;;  %v849_v21 = vpop.xlane.xlu1 %848 }
 0x1e5   : > { %2114 = vpow2.f32 %v928_v8  ;;  %977 = vadd.xlane.f32.xlu0 %v976_v34  ;;  %v888_v31 = vsub.f32 %v2753_v14, %v849_v21  ;;  %v889_v60 = vsub.f32 %v2758_v33, %v849_v21  ;;  %v979_v5 = vadd.f32 %v3039_v41, %v3035_v42 }
 0x1e6   : > { %2116 = vpow2.f32 %v930_v15 }
 0x1e7   : > { %2118 = vpow2.f32 %v932_v7  ;;  %v934_v4 = vmul.f32 1.442695, %v888_v31  ;;  %v936_v20 = vmul.f32 1.442695, %v889_v60  ;;  %980 = vadd.xlane.f32.xlu1 %v979_v5 }
 0x1e8   : > { %v852_v35 = vpop.xlane.xlu0 %851 }
 0x1e9   : > { %2120 = vpow2.f32 %v934_v4  ;;  %v890_v50 = vsub.f32 %v2792_v32, %v852_v35  ;;  %v891_v62 = vsub.f32 %v2798_v25, %v852_v35 }
 0x1ea   : > { %2122 = vpow2.f32 %v936_v20 }
 0x1eb   : > { %v938_v16 = vmul.f32 1.442695, %v890_v50  ;;  %v940_v36 = vmul.f32 1.442695, %v891_v62 }
 0x1ec   : > { %v3047_v14 = vpop.eup %2108  ;;  %v855_v33 = vpop.xlane.xlu1 %854 }
 0x1ed   : > { %v3049_v49 = vpop.eup %2110  ;;  %2124 = vpow2.f32 %v938_v16  ;;  %v892_v1 = vsub.f32 %v2814_v3, %v855_v33  ;;  %v893_v8 = vsub.f32 %v2818_v52, %v855_v33 }
 0x1ee   : > { %v3053_v47 = vpop.eup %2112  ;;  %2126 = vpow2.f32 %v940_v36  ;;  %v982_v32 = vadd.f32 %v3049_v49, %v3047_v14 }
 0x1ef   : > { %v3057_v25 = vpop.eup %2114  ;;  %v942_v48 = vmul.f32 1.442695, %v892_v1  ;;  %v944_v27 = vmul.f32 1.442695, %v893_v8 }
 0x1f0   : > { %v3059_v38 = vpop.eup %2116  ;;  %983 = vadd.xlane.f32.xlu0 %v982_v32  ;;  %v985_v34 = vadd.f32 %v3057_v25, %v3053_v47  ;;  %v858_v15 = vpop.xlane.xlu0 %857 }
 0x1f1   : > { %v3063_v3 = vpop.eup %2118  ;;  %2128 = vpow2.f32 %v942_v48  ;;  %v894_v52 = vsub.f32 %v2826_v44, %v858_v15  ;;  %v895_v7 = vsub.f32 %v2828_v30, %v858_v15 }
 0x1f2   : > { %2130 = vpow2.f32 %v944_v27  ;;  %986 = vadd.xlane.f32.xlu1 %v985_v34  ;;  %v988_v21 = vadd.f32 %v3063_v3, %v3059_v38 }
 0x1f3   : > { %v3069_v31 = vpop.eup %2120  ;;  %v946_v60 = vmul.f32 1.442695, %v894_v52  ;;  %v948_v5 = vmul.f32 1.442695, %v895_v7 }
 0x1f4   : > { %v3071_v4 = vpop.eup %2122  ;;  %989 = vadd.xlane.f32.xlu0 %v988_v21  ;;  %v861_v20 = vpop.xlane.xlu1 %860 }
 0x1f5   : > { %2132 = vpow2.f32 %v946_v60  ;;  %v896_v35 = vsub.f32 %v2832_v37, %v861_v20  ;;  %v897_v44 = vsub.f32 %v2837_v56, %v861_v20  ;;  %v991_v30 = vadd.f32 %v3071_v4, %v3069_v31 }
 0x1f6   : > { %2134 = vpow2.f32 %v948_v5 }
 0x1f7   : > { %v3077_v50 = vpop.eup %2124  ;;  %v950_v62 = vmul.f32 1.442695, %v896_v35  ;;  %v952_v16 = vmul.f32 1.442695, %v897_v44  ;;  %992 = vadd.xlane.f32.xlu1 %v991_v30 }
 0x1f8   : > { %v3079_v36 = vpop.eup %2126  ;;  %v864_v33 = vpop.xlane.xlu0 %863 }
 0x1f9   : > { %2136 = vpow2.f32 %v950_v62  ;;  %v898_v1 = vsub.f32 %v2858_v57, %v864_v33  ;;  %v899_v8 = vsub.f32 %v2860_v63, %v864_v33  ;;  %v994_v37 = vadd.f32 %v3079_v36, %v3077_v50 }
 0x1fa   : > { %2138 = vpow2.f32 %v952_v16 }
 0x1fb   : > { %v3085_v56 = vpop.eup %2128  ;;  %v954_v32 = vmul.f32 1.442695, %v898_v1  ;;  %v956_v48 = vmul.f32 1.442695, %v899_v8  ;;  %995 = vadd.xlane.f32.xlu0 %v994_v37 }
 0x1fc   : > { %v3087_v27 = vpop.eup %2130  ;;  %v867_v34 = vpop.xlane.xlu1 %866 }
 0x1fd   : > { %2140 = vpow2.f32 %v954_v32  ;;  %v900_v15 = vsub.f32 %v2885_v0, %v867_v34  ;;  %v901_v52 = vsub.f32 %v2887_v59, %v867_v34  ;;  %v997_v63 = vadd.f32 %v3087_v27, %v3085_v56 }
 0x1fe   : > { %2142 = vpow2.f32 %v956_v48 }
 0x1ff   : > { %v3093_v57 = vpop.eup %2132  ;;  %v958_v7 = vmul.f32 1.442695, %v900_v15  ;;  %v960_v21 = vmul.f32 1.442695, %v901_v52  ;;  %998 = vadd.xlane.f32.xlu1 %v997_v63 }
 0x200   : > { %v3095_v60 = vpop.eup %2134  ;;  %v870_v5 = vpop.xlane.xlu0 %869 }
 0x201   : > { %2144 = vpow2.f32 %v958_v7  ;;  %v902_v20 = vsub.f32 %v2900_v24, %v870_v5  ;;  %v903_v35 = vsub.f32 %v2902_v55, %v870_v5  ;;  %v1000_v59 = vadd.f32 %v3095_v60, %v3093_v57 }
 0x202   : > { %2146 = vpow2.f32 %v960_v21 }
 0x203   : > { %v3101_v0 = vpop.eup %2136  ;;  %v962_v44 = vmul.f32 1.442695, %v902_v20  ;;  %v964_v30 = vmul.f32 1.442695, %v903_v35  ;;  %1001 = vadd.xlane.f32.xlu0 %v1000_v59 }
 0x204   : > { %v3103_v62 = vpop.eup %2138  ;;  %v873_v16 = vpop.xlane.xlu1 %872 }
 0x205   : > { %2148 = vpow2.f32 %v962_v44  ;;  %v904_v33 = vsub.f32 %v2911_v46, %v873_v16  ;;  %v905_v1 = vsub.f32 %v2913_v53, %v873_v16  ;;  %v1003_v24 = vadd.f32 %v3103_v62, %v3101_v0 }
 0x206   : > { %2150 = vpow2.f32 %v964_v30 }
 0x207   : > { %v3109_v55 = vpop.eup %2140  ;;  %v966_v8 = vmul.f32 1.442695, %v904_v33  ;;  %v968_v37 = vmul.f32 1.442695, %v905_v1  ;;  %1004 = vadd.xlane.f32.xlu1 %v1003_v24 }
 0x208   : > { %v3111_v32 = vpop.eup %2142 }
 0x209   : > { %2152 = vpow2.f32 %v966_v8  ;;  %v1006_v48 = vadd.f32 %v3111_v32, %v3109_v55 }
 0x20a   : > { %2154 = vpow2.f32 %v968_v37 }
 0x20b   : > { %v3115_v34 = vpop.eup %2144  ;;  %1007 = vadd.xlane.f32.xlu0 %v1006_v48 }
 0x20c   : > { %v3117_v46 = vpop.eup %2146 }
 0x20d   : > { %v1009_v53 = vadd.f32 %v3117_v46, %v3115_v34 }
 0x20f   : > { %v3121_v15 = vpop.eup %2148  ;;  %1010 = vadd.xlane.f32.xlu1 %v1009_v53 }
 0x210   : > { %v3123_v52 = vpop.eup %2150 }
 0x211   : > { %v1012_v63 = vadd.f32 %v3123_v52, %v3121_v15 }
 0x213   : > { %v3127_v7 = vpop.eup %2152  ;;  %1013 = vadd.xlane.f32.xlu0 %v1012_v63 }
 0x214   : > { %v3129_v21 = vpop.eup %2154 }
 0x215   : > { %v1015_v5 = vadd.f32 %v3129_v21, %v3127_v7 }
 0x217   : > { %1016 = vadd.xlane.f32.xlu1 %v1015_v5 }
 0x233   : > { %v3133_v20 = vpop.f32.mrb[64].mxu0 }
 0x234   : > { %v733_v35 = vpop.f32.mrb[65].mxu0 }
 0x237   : > { %v3135_v59 = vpop.f32.mrb[66].mxu0 }
 0x238   : > { %v739_v30 = vpop.f32.mrb[67].mxu0 }
 0x239   : > { %v1355_v16 = vpack.c.bf16 %v739_v30, %v733_v35 }
 0x23b   : > { %1418 = vmatprep.mubr.bf16.mxu1 %v1355_v16  ;;  %v3139_v33 = vpop.f32.mrb[68].mxu0 }
 0x23c   : > { %v3141_v1 = vpop.f32.mrb[69].mxu0 }
 0x23f   : > { %v3143_v24 = vpop.f32.mrb[70].mxu0 }
 0x240   : > { %v3147_v37 = vpop.f32.mrb[71].mxu0 }
 0x243   : > { %v3151_v53 = vpop.f32.mrb[72].mxu0 }
 0x244   : > { %v3153_v63 = vpop.f32.mrb[73].mxu0 }
 0x247   : > { %v3155_v5 = vpop.f32.mrb[74].mxu0 }
 0x248   : > { %v3159_v30 = vpop.f32.mrb[75].mxu0 }
 0x24b   : > { %v3163_v8 = vpop.f32.mrb[76].mxu0 }
 0x24c   : > { %v3165_v44 = vpop.f32.mrb[77].mxu0 }
 0x24f   : > { %v3167_v58 = vpop.f32.mrb[78].mxu0 }
 0x250   : > { %v3171_v10 = vpop.f32.mrb[79].mxu0 }
 0x253   : > { %v3175_v35 = vpop.f32.mrb[80].mxu0 }
 0x254   : > { %3579 = vst [vmem:[#allocation37_spill] sm:$0xff] %v3175_v35  ;;  %v3177_v11 = vpop.f32.mrb[81].mxu0 }
 0x257   : > { %v3179_v22 = vpop.f32.mrb[82].mxu0 }
 0x258   : > { %v3183_v39 = vpop.f32.mrb[83].mxu0 }
 0x25b   : > { %v3187_v48 = vpop.f32.mrb[84].mxu0 }
 0x25c   : > { %3580 = vst [vmem:[#allocation38_spill] sm:$0xff] %v3187_v48  ;;  %v3189_v51 = vpop.f32.mrb[85].mxu0 }
 0x25d   : > { %3581 = vst [vmem:[#allocation39_spill] sm:$0xff] %v3189_v51 }
 0x25f   : > { %v3191_v2 = vpop.f32.mrb[86].mxu0 }
 0x260   : > { %3582 = vst [vmem:[#allocation40_spill] sm:$0xff] %v3191_v2  ;;  %v3195_v54 = vpop.f32.mrb[87].mxu0 }
 0x261   : > { %3583 = vst [vmem:[#allocation41_spill] sm:$0xff] %v3195_v54 }
 0x263   : > { %v3199_v16 = vpop.f32.mrb[88].mxu0 }
 0x264   : > { %3584 = vst [vmem:[#allocation42_spill] sm:$0xff] %v3199_v16  ;;  %v3201_v40 = vpop.f32.mrb[89].mxu0 }
 0x265   : > { %3585 = vst [vmem:[#allocation43_spill] sm:$0xff] %v3201_v40 }
 0x267   : > { %v3203_v19 = vpop.f32.mrb[90].mxu0 }
 0x268   : > { %3586 = vst [vmem:[#allocation44_spill] sm:$0xff] %v3203_v19  ;;  %v3207_v13 = vpop.f32.mrb[91].mxu0 }
 0x269   : > { %3587 = vst [vmem:[#allocation45_spill] sm:$0xff] %v3207_v13 }
 0x26b   : > { %v3211_v28 = vpop.f32.mrb[92].mxu0 }
 0x26c   : > { %v972_v17 = vpop.xlane.xlu0 %971  ;;  %3588 = vst [vmem:[#allocation46_spill] sm:$0xff] %v3211_v28  ;;  %v3213_v45 = vpop.f32.mrb[93].mxu0 }
 0x26d   : > { %2156 = vrcp.f32 %v972_v17  ;;  %3589 = vst [vmem:[#allocation47_spill] sm:$0xff] %v3213_v45 }
 0x26f   : > { %v3215_v2 = vpop.f32.mrb[94].mxu0 }
 0x270   : > { %v975_v61 = vpop.xlane.xlu1 %974  ;;  %3590 = vst [vmem:[#allocation48_spill] sm:$0xff] %v3215_v2  ;;  %v3219_v16 = vpop.f32.mrb[95].mxu0 }
 0x271   : > { %2158 = vrcp.f32 %v975_v61 }
 0x272   : > { %v978_v48 = vpop.xlane.xlu0 %977 }
 0x273   : > { %2160 = vrcp.f32 %v978_v48 }
 0x274   : > { %v981_v51 = vpop.xlane.xlu1 %980 }
 0x275   : > { %2162 = vrcp.f32 %v981_v51 }
 0x277   : > { %v2157_v9 = vpop.eup %2156 }
 0x278   : > { %v1035_v40 = vmul.f32 %v2157_v9, %v3015_v26  ;;  %v1034_v48 = vmul.f32 %v2157_v9, %v3013_v12 }
 0x27b   : > { %v2159_v19 = vpop.eup %2158 }
 0x27c   : > { %v1037_v61 = vmul.f32 %v2159_v19, %v3025_v23  ;;  %v1036_v13 = vmul.f32 %v2159_v19, %v3023_v29 }
 0x27d   : > { %v2161_v54 = vpop.eup %2160  ;;  %v984_v35 = vpop.xlane.xlu0 %983 }
 0x27e   : > { %2164 = vrcp.f32 %v984_v35  ;;  %v1371_v43 = vpack.c.bf16 %v1037_v61, %v1035_v40  ;;  %v1370_v28 = vpack.c.bf16 %v1036_v13, %v1034_v48  ;;  %v1039_v17 = vmul.f32 %v2161_v54, %v3031_v18 }
 0x27f   : > { %v2163_v2 = vpop.eup %2162  ;;  %v987_v51 = vpop.xlane.xlu1 %986  ;;  %v1038_v19 = vmul.f32 %v2161_v54, %v3027_v6 }
 0x280   : > { %1386 = vmatprep.subr.bf16.mxu1 %v1371_v43  ;;  %2166 = vrcp.f32 %v987_v51  ;;  %v1041_v45 = vmul.f32 %v2163_v2, %v3039_v41  ;;  %v1040_v23 = vmul.f32 %v2163_v2, %v3035_v42 }
 0x281   : > { %1387 = vmatpush1.bf16.xpose.msra.mxu1 %v1370_v28  ;;  %v990_v26 = vpop.xlane.xlu0 %989 }
 0x282   : > { %v1373_v9 = vpack.c.bf16 %v1041_v45, %v1039_v17  ;;  %2168 = vrcp.f32 %v990_v26  ;;  %v1372_v13 = vpack.c.bf16 %v1040_v23, %v1038_v19 }
 0x284   : > { %1388 = vmatprep.subr.bf16.mxu1 %v1373_v9  ;;  %v993_v12 = vpop.xlane.xlu1 %992 }
 0x285   : > { %2170 = vrcp.f32 %v993_v12 }
 0x288   : > { %v2165_v40 = vpop.eup %2164  ;;  %v996_v29 = vpop.xlane.xlu0 %995 }
 0x289   : > { %1389 = vmatpush1.bf16.xpose.msra.mxu1 %v1372_v13  ;;  %2172 = vrcp.f32 %v996_v29  ;;  %v1043_v18 = vmul.f32 %v2165_v40, %v3049_v49  ;;  %v1042_v41 = vmul.f32 %v2165_v40, %v3047_v14 }
 0x28a   : > { %v2167_v43 = vpop.eup %2166 }
 0x28b   : > { %v1045_v28 = vmul.f32 %v2167_v43, %v3057_v25  ;;  %v1044_v45 = vmul.f32 %v2167_v43, %v3053_v47 }
 0x28c   : > { %v999_v2 = vpop.xlane.xlu1 %998  ;;  %v2169_v42 = vpop.eup %2168 }
 0x28d   : > { %v1375_v54 = vpack.c.bf16 %v1045_v28, %v1043_v18  ;;  %2174 = vrcp.f32 %v999_v2  ;;  %v1374_v6 = vpack.c.bf16 %v1044_v45, %v1042_v41  ;;  %v1047_v61 = vmul.f32 %v2169_v42, %v3063_v3 }
 0x28e   : > { %v1046_v14 = vmul.f32 %v2169_v42, %v3059_v38 }
 0x28f   : > { %v2171_v35 = vpop.eup %2170  ;;  %1390 = vmatprep.subr.bf16.mxu1 %v1375_v54 }
 0x290   : > { %v1002_v17 = vpop.xlane.xlu0 %1001  ;;  %v1049_v48 = vmul.f32 %v2171_v35, %v3071_v4  ;;  %v1048_v49 = vmul.f32 %v2171_v35, %v3069_v31 }
 0x291   : > { %1391 = vmatpush1.bf16.xpose.msra.mxu1 %v1374_v6  ;;  %2176 = vrcp.f32 %v1002_v17 }
 0x292   : > { %v1377_v25 = vpack.c.bf16 %v1049_v48, %v1047_v61  ;;  %v1376_v26 = vpack.c.bf16 %v1048_v49, %v1046_v14  ;;  %v3615_v14 = vld [vmem:[#allocation48_spill] sm:$0xff] }
 0x293   : > { %v2173_v47 = vpop.eup %2172 }
 0x294   : > { %1392 = vmatprep.subr.bf16.mxu1 %v1377_v25  ;;  %v1005_v51 = vpop.xlane.xlu1 %1004  ;;  %v1051_v19 = vmul.f32 %v2173_v47, %v3079_v36  ;;  %v1050_v31 = vmul.f32 %v2173_v47, %v3077_v50  ;;  %v3611_v25 = vld [vmem:[#allocation42_spill] sm:$0xff] }
 0x295   : > { %2178 = vrcp.f32 %v1005_v51  ;;  %v3616_v47 = vld [vmem:[#allocation46_spill] sm:$0xff] }
 0x296   : > { %v3617_v51 = vpack.c.bf16 %v3615_v14, %v3616_v47 }
 0x297   : > { %v2175_v23 = vpop.eup %2174 }
 0x298   : > { %v1008_v9 = vpop.xlane.xlu0 %1007  ;;  %v1053_v3 = vmul.f32 %v2175_v23, %v3087_v27  ;;  %v1052_v4 = vmul.f32 %v2175_v23, %v3085_v56  ;;  %v3618_v23 = vmov 0.0  }
 0x299   : > { %1393 = vmatpush1.bf16.xpose.msra.mxu1 %v1376_v26  ;;  %2180 = vrcp.f32 %v1008_v9  ;;  %v2255_v26 = vmov 0.0|0.0  }
 0x29a   : > { %v1379_v12 = vpack.c.bf16 %v1053_v3, %v1051_v19  ;;  %v1378_v40 = vpack.c.bf16 %v1052_v4, %v1050_v31  ;;  %v1483_v19 = vld [vmem:[%s3489_s6] sm:$0xff] }
 0x29b   : > { %v2177_v13 = vpop.eup %2176 }
 0x29c   : > { %1394 = vmatprep.subr.bf16.mxu1 %v1379_v12  ;;  %v1011_v38 = vpop.xlane.xlu1 %1010  ;;  %v1055_v18 = vmul.f32 %v2177_v13, %v3095_v60  ;;  %v1054_v56 = vmul.f32 %v2177_v13, %v3093_v57 }
 0x29d   : > { %2182 = vrcp.f32 %v1011_v38 }
 0x29f   : > { %v2179_v29 = vpop.eup %2178 }
 0x2a0   : > { %v1014_v43 = vpop.xlane.xlu0 %1013  ;;  %v1057_v36 = vmul.f32 %v2179_v29, %v3103_v62  ;;  %v1056_v27 = vmul.f32 %v2179_v29, %v3101_v0  ;;  %v1485_v29 = vld [vmem:[%s3489_s6 + $0x10] sm:$0xff] }
 0x2a1   : > { %1395 = vmatpush1.bf16.xpose.msra.mxu1 %v1378_v40  ;;  %2184 = vrcp.f32 %v1014_v43  ;;  %v1486_v43 = vld [vmem:[%s3489_s6 + $0x18] sm:$0xff] }
 0x2a2   : > { %v1381_v28 = vpack.c.bf16 %v1057_v36, %v1055_v18  ;;  %v1380_v45 = vpack.c.bf16 %v1056_v27, %v1054_v56 }
 0x2a3   : > { %v2181_v41 = vpop.eup %2180 }
 0x2a4   : > { %1396 = vmatprep.subr.bf16.mxu1 %v1381_v28  ;;  %v1017_v50 = vpop.xlane.xlu1 %1016  ;;  %v1059_v42 = vmul.f32 %v2181_v41, %v3111_v32  ;;  %v1058_v0 = vmul.f32 %v2181_v41, %v3109_v55  ;;  %v3591_v55 = vpack.c.bf16 %v3135_v59, %v3133_v20  ;;  %v3597_v20 = vpack.c.bf16 %v3167_v58, %v3163_v8  ;;  %v3610_v8 = vld [vmem:[#allocation44_spill] sm:$0xff] }
 0x2a5   : > { %2186 = vrcp.f32 %v1017_v50  ;;  %v3598_v59 = vpack.c.bf16 %v3183_v39, %v3177_v11  ;;  %v3612_v39 = vpack.c.bf16 %v3610_v8, %v3611_v25  ;;  %v3613_v11 = vld [vmem:[#allocation47_spill] sm:$0xff]  ;;  %v1495_v25 = vld [vmem:[%s3489_s6 + $0x60] sm:$0xff] }
 0x2a7   : > { %v2183_v2 = vpop.eup %2182 }
 0x2a8   : > { %v1061_v54 = vmul.f32 %v2183_v2, %v3117_v46  ;;  %v1060_v60 = vmul.f32 %v2183_v2, %v3115_v34  ;;  %v3592_v34 = vpack.c.bf16 %v3147_v37, %v3141_v1  ;;  %v3602_v37 = vld [vmem:[#allocation39_spill] sm:$0xff]  ;;  %v1488_v2 = vld [vmem:[%s3489_s6 + $0x28] sm:$0xff] }
 0x2a9   : > { %1397 = vmatpush1.bf16.xpose.msra.mxu1 %v1380_v45  ;;  %v1487_v45 = vld [vmem:[%s3489_s6 + $0x20] sm:$0xff] }
 0x2aa   : > { %v1383_v62 = vpack.c.bf16 %v1061_v54, %v1059_v42  ;;  %v1382_v35 = vpack.c.bf16 %v1060_v60, %v1058_v0 }
 0x2ab   : > { %v2185_v6 = vpop.eup %2184 }
 0x2ac   : > { %1398 = vmatprep.subr.bf16.mxu1 %v1383_v62  ;;  %v1063_v17 = vmul.f32 %v2185_v6, %v3123_v52  ;;  %v1062_v46 = vmul.f32 %v2185_v6, %v3121_v15  ;;  %v3593_v52 = vpack.c.bf16 %v3143_v24, %v3139_v33  ;;  %v3595_v15 = vpack.c.bf16 %v3155_v5, %v3151_v53  ;;  %v3599_v33 = vld [vmem:[#allocation37_spill] sm:$0xff]  ;;  %v3605_v5 = vld [vmem:[#allocation38_spill] sm:$0xff] }
 0x2ad   : > { %v3600_v1 = vpack.c.bf16 %v3179_v22, %v3599_v33  ;;  %v3601_v24 = vld [vmem:[#allocation41_spill] sm:$0xff]  ;;  %v3614_v22 = vpack.c.bf16 %v3219_v16, %v3613_v11  ;;  %v1484_v16 = vld [vmem:[%s3489_s6 + $0x8] sm:$0xff] }
 0x2ae   : > { %v3603_v53 = vpack.c.bf16 %v3601_v24, %v3602_v37  ;;  %v1493_v37 = vld [vmem:[%s3489_s6 + $0x50] sm:$0xff] }
 0x2af   : > { %v2187_v57 = vpop.eup %2186 }
 0x2b0   : > { %v1065_v61 = vmul.f32 %v2187_v57, %v3129_v21  ;;  %v1064_v48 = vmul.f32 %v2187_v57, %v3127_v7  ;;  %v3594_v7 = vpack.c.bf16 %v3159_v30, %v3153_v63  ;;  %v3596_v21 = vpack.c.bf16 %v3171_v10, %v3165_v44  ;;  %v3604_v63 = vld [vmem:[#allocation40_spill] sm:$0xff]  ;;  %v3607_v44 = vld [vmem:[#allocation45_spill] sm:$0xff]  ;;  %v3608_v30 = vld [vmem:[#allocation43_spill] sm:$0xff] }
 0x2b1   : > { %1399 = vmatpush1.bf16.xpose.msra.mxu1 %v1382_v35  ;;  %v3606_v10 = vpack.c.bf16 %v3604_v63, %v3605_v5  ;;  %v3609_v58 = vpack.c.bf16 %v3607_v44, %v3608_v30  ;;  %v1489_v57 = vld [vmem:[%s3489_s6 + $0x30] sm:$0xff] }
 0x2b2   : > { %v1385_v32 = vpack.c.bf16 %v1065_v61, %v1063_v17  ;;  %v1384_v49 = vpack.c.bf16 %v1064_v48, %v1062_v46  ;;  %v1490_v17 = vld [vmem:[%s3489_s6 + $0x38] sm:$0xff] }
 0x2b4   : > { %1400 = vmatprep.subr.bf16.mxu1 %v1385_v32 }
 0x2b9   : > { %1401 = vmatpush1.bf16.xpose.msra.mxu1 %v1384_v49 }
 0x2ba   : > { %1930 = vmatprep.subr.bf16.mxu1 %v2255_v26 }
 0x2c0   : > { %1419 = vmatmul.mubr.bf16.vlgmr.msra.gmra.mrb[0].mxu1 %v3591_v55 }
 0x2c1   : > { %1426 = vmatprep.mubr.bf16.mxu1 %v3592_v34 }
 0x2c8   : > { %1427 = vmatmul.mubr.bf16.gmra.mrb[4].mxu1 %v3593_v52  ;;  %v1491_v52 = vld [vmem:[%s3489_s6 + $0x40] sm:$0xff] }
 0x2c9   : > { %1434 = vmatprep.mubr.bf16.mxu1 %v3594_v7  ;;  %v1492_v7 = vld [vmem:[%s3489_s6 + $0x48] sm:$0xff] }
 0x2d0   : > { %1435 = vmatmul.mubr.bf16.gmra.mrb[8].mxu1 %v3595_v15 }
 0x2d1   : > { %1442 = vmatprep.mubr.bf16.mxu1 %v3596_v21 }
 0x2d8   : > { %1443 = vmatmul.mubr.bf16.gmra.mrb[12].mxu1 %v3597_v20 }
 0x2d9   : > { %1450 = vmatprep.mubr.bf16.mxu1 %v3598_v59 }
 0x2e0   : > { %1451 = vmatmul.mubr.bf16.gmra.mrb[16].mxu1 %v3600_v1 }
 0x2e1   : > { %1458 = vmatprep.mubr.bf16.mxu1 %v3603_v53  ;;  %v1494_v53 = vld [vmem:[%s3489_s6 + $0x58] sm:$0xff] }
 0x2e8   : > { %1459 = vmatmul.mubr.bf16.gmra.mrb[20].mxu1 %v3606_v10 }
 0x2e9   : > { %1466 = vmatprep.mubr.bf16.mxu1 %v3609_v58 }
 0x2f0   : > { %1467 = vmatmul.mubr.bf16.gmra.mrb[24].mxu1 %v3612_v39  ;;  %v1496_v39 = vld [vmem:[%s3489_s6 + $0x68] sm:$0xff] }
 0x2f1   : > { %1474 = vmatprep.mubr.bf16.mxu1 %v3614_v22 }
 0x2f8   : > { %1475 = vmatmul.mubr.bf16.gmra.mrb[28].mxu1 %v3617_v51 }
 0x2f9   : > { %1927 = vmatprep.mubr.msk.f32.mxu1 %vm2256_vm1, %v3618_v23 }
 0x393   : > { %v1420_v9 = vpop.f32.mrb[0].mxu1 }
 0x394   : > { %v1422_v3 = vpop.f32.mrb[1].mxu1  ;;  %v1499_v12 = vmul.f32 %v1483_v19, %v1420_v9  ;;  %v1497_v19 = vld [vmem:[%s3489_s6 + $0x70] sm:$0xff] }
 0x395   : > { %v1423_v4 = vpop.f32.mrb[2].mxu1 }
 0x396   : > { %v1500_v31 = vmul.f32 %v1484_v16, %v1423_v4  ;;  %v1425_v38 = vpop.f32.mrb[3].mxu1  ;;  %v1498_v16 = vld [vmem:[%s3489_s6 + $0x78] sm:$0xff] }
 0x398   : > { %v1931_v13 = vpack.c.bf16 %v1500_v31, %v1499_v12 }
 0x39a   : > { %1932 = vmatpush3.bf16.msra.mxu1 %v1931_v13 }
 0x39b   : > { %v1428_v40 = vpop.f32.mrb[4].mxu1  ;;  %1933 = vmatprep.subr.bf16.mxu1 %v2255_v26 }
 0x39c   : > { %v1430_v18 = vpop.f32.mrb[5].mxu1  ;;  %v1501_v27 = vmul.f32 %v1485_v29, %v1428_v40  ;;  %v1515_v40 = vld [vmem:[%s3619_s2] sm:$0xff]  ;;  %v3620_v29 = vld [vmem:[#allocation10_spill] sm:$0xff] }
 0x39d   : > { %v1431_v36 = vpop.f32.mrb[6].mxu1 }
 0x39e   : > { %v1502_v28 = vmul.f32 %v1486_v43, %v1431_v36  ;;  %v1433_v56 = vpop.f32.mrb[7].mxu1  ;;  %v3621_v43 = vld [vmem:[#allocation9_spill] sm:$0xff]  ;;  %v3623_v36 = vld [vmem:[#allocation6_spill] sm:$0xff] }
 0x39f   : > { %v3622_v18 = vpack.c.bf16 %v3620_v29, %v3621_v43  ;;  %v3627_v56 = vld [vmem:[#allocation11_spill] sm:$0xff] }
 0x3a0   : > { %v1934_v50 = vpack.c.bf16 %v1502_v28, %v1501_v27  ;;  %v3624_v27 = vld [vmem:[#allocation5_spill] sm:$0xff] }
 0x3a1   : > { %v3625_v28 = vpack.c.bf16 %v3623_v36, %v3624_v27 }
 0x3a2   : > { %1935 = vmatpush3.bf16.msra.mxu1 %v1934_v50 }
 0x3a3   : > { %v1436_v41 = vpop.f32.mrb[8].mxu1  ;;  %1936 = vmatprep.subr.bf16.mxu1 %v2255_v26 }
 0x3a4   : > { %v1438_v42 = vpop.f32.mrb[9].mxu1  ;;  %v1503_v60 = vmul.f32 %v1487_v45, %v1436_v41  ;;  %v3629_v41 = vld [vmem:[#allocation8_spill] sm:$0xff]  ;;  %v3630_v45 = vld [vmem:[#allocation7_spill] sm:$0xff] }
 0x3a5   : > { %v1439_v54 = vpop.f32.mrb[10].mxu1  ;;  %v3632_v42 = vld [vmem:[#allocation18_spill] sm:$0xff] }
 0x3a6   : > { %v1504_v62 = vmul.f32 %v1488_v2, %v1439_v54  ;;  %v1441_v0 = vpop.f32.mrb[11].mxu1  ;;  %v3631_v2 = vpack.c.bf16 %v3629_v41, %v3630_v45  ;;  %v3633_v54 = vld [vmem:[#allocation17_spill] sm:$0xff] }
 0x3a7   : > { %v3636_v0 = vld [vmem:[#allocation13_spill] sm:$0xff] }
 0x3a8   : > { %v1937_v6 = vpack.c.bf16 %v1504_v62, %v1503_v60  ;;  %v3634_v60 = vpack.c.bf16 %v3632_v42, %v3633_v54  ;;  %v3635_v62 = vld [vmem:[#allocation14_spill] sm:$0xff] }
 0x3aa   : > { %1938 = vmatpush3.bf16.msra.mxu1 %v1937_v6  ;;  %v3637_v6 = vpack.c.bf16 %v3635_v62, %v3636_v0 }
 0x3ab   : > { %v1444_v35 = vpop.f32.mrb[12].mxu1  ;;  %1939 = vmatprep.subr.bf16.mxu1 %v2255_v26 }
 0x3ac   : > { %v1446_v61 = vpop.f32.mrb[13].mxu1  ;;  %v1505_v32 = vmul.f32 %v1489_v57, %v1444_v35  ;;  %v3638_v35 = vld [vmem:[#allocation20_spill] sm:$0xff]  ;;  %v3639_v57 = vld [vmem:[#allocation19_spill] sm:$0xff] }
 0x3ad   : > { %v1447_v48 = vpop.f32.mrb[14].mxu1  ;;  %v3641_v61 = vld [vmem:[#allocation16_spill] sm:$0xff] }
 0x3ae   : > { %v1506_v46 = vmul.f32 %v1490_v17, %v1447_v48  ;;  %v1449_v49 = vpop.f32.mrb[15].mxu1  ;;  %v3640_v17 = vpack.c.bf16 %v3638_v35, %v3639_v57  ;;  %v3642_v48 = vld [vmem:[#allocation15_spill] sm:$0xff] }
 0x3af   : > { %v3645_v49 = vld [vmem:[#allocation25_spill] sm:$0xff] }
 0x3b0   : > { %v1940_v55 = vpack.c.bf16 %v1506_v46, %v1505_v32  ;;  %v3643_v32 = vpack.c.bf16 %v3641_v61, %v3642_v48  ;;  %v3644_v46 = vld [vmem:[#allocation26_spill] sm:$0xff] }
 0x3b2   : > { %1941 = vmatpush3.bf16.msra.mxu1 %v1940_v55  ;;  %v3646_v55 = vpack.c.bf16 %v3644_v46, %v3645_v49 }
 0x3b3   : > { %v1452_v34 = vpop.f32.mrb[16].mxu1  ;;  %1942 = vmatprep.subr.bf16.mxu1 %v2255_v26 }
 0x3b4   : > { %v1454_v15 = vpop.f32.mrb[17].mxu1  ;;  %v1507_v20 = vmul.f32 %v1491_v52, %v1452_v34  ;;  %v3647_v34 = vld [vmem:[#allocation22_spill] sm:$0xff]  ;;  %v3648_v52 = vld [vmem:[#allocation21_spill] sm:$0xff] }
 0x3b5   : > { %v1455_v21 = vpop.f32.mrb[18].mxu1  ;;  %v3650_v15 = vld [vmem:[#allocation28_spill] sm:$0xff] }
 0x3b6   : > { %v1508_v59 = vmul.f32 %v1492_v7, %v1455_v21  ;;  %v1457_v33 = vpop.f32.mrb[19].mxu1  ;;  %v3649_v7 = vpack.c.bf16 %v3647_v34, %v3648_v52  ;;  %v3651_v21 = vld [vmem:[#allocation27_spill] sm:$0xff] }
 0x3b7   : > { %v3654_v33 = vld [vmem:[#allocation23_spill] sm:$0xff] }
 0x3b8   : > { %v1943_v1 = vpack.c.bf16 %v1508_v59, %v1507_v20  ;;  %v3652_v20 = vpack.c.bf16 %v3650_v15, %v3651_v21  ;;  %v3653_v59 = vld [vmem:[#allocation24_spill] sm:$0xff] }
 0x3ba   : > { %1944 = vmatpush3.bf16.msra.mxu1 %v1943_v1  ;;  %v3655_v1 = vpack.c.bf16 %v3653_v59, %v3654_v33 }
 0x3bb   : > { %v1460_v24 = vpop.f32.mrb[20].mxu1  ;;  %1945 = vmatprep.subr.bf16.mxu1 %v2255_v26 }
 0x3bc   : > { %v1462_v63 = vpop.f32.mrb[21].mxu1  ;;  %v1509_v10 = vmul.f32 %v1493_v37, %v1460_v24  ;;  %v3656_v24 = vld [vmem:[#allocation34_spill] sm:$0xff]  ;;  %v3657_v37 = vld [vmem:[#allocation33_spill] sm:$0xff] }
 0x3bd   : > { %v1463_v5 = vpop.f32.mrb[22].mxu1  ;;  %v3659_v63 = vld [vmem:[#allocation30_spill] sm:$0xff] }
 0x3be   : > { %v1510_v44 = vmul.f32 %v1494_v53, %v1463_v5  ;;  %v1465_v30 = vpop.f32.mrb[23].mxu1  ;;  %v3658_v53 = vpack.c.bf16 %v3656_v24, %v3657_v37  ;;  %v3660_v5 = vld [vmem:[#allocation29_spill] sm:$0xff] }
 0x3bf   : > { %v3663_v30 = vld [vmem:[#allocation35_spill] sm:$0xff] }
 0x3c0   : > { %v1946_v58 = vpack.c.bf16 %v1510_v44, %v1509_v10  ;;  %v3661_v10 = vpack.c.bf16 %v3659_v63, %v3660_v5  ;;  %v3662_v44 = vld [vmem:[#allocation36_spill] sm:$0xff] }
 0x3c2   : > { %1947 = vmatpush3.bf16.msra.mxu1 %v1946_v58  ;;  %v3664_v58 = vpack.c.bf16 %v3662_v44, %v3663_v30  ;;  %v1718_v44 = vld [vmem:[%s3487_s4] sm:$0xff] }
 0x3c3   : > { %v1468_v8 = vpop.f32.mrb[24].mxu1  ;;  %1948 = vmatprep.subr.bf16.mxu1 %v2255_v26 }
 0x3c4   : > { %v1470_v11 = vpop.f32.mrb[25].mxu1  ;;  %v1511_v14 = vmul.f32 %v1495_v25, %v1468_v8  ;;  %v3665_v8 = vld [vmem:[#allocation32_spill] sm:$0xff]  ;;  %v3666_v25 = vld [vmem:[#allocation31_spill] sm:$0xff] }
 0x3c5   : > { %v1471_v22 = vpop.f32.mrb[26].mxu1  ;;  %v2257_v11 = vmov 0  }
 0x3c6   : > { %v1512_v47 = vmul.f32 %v1496_v39, %v1471_v22  ;;  %v1473_v51 = vpop.f32.mrb[27].mxu1  ;;  %v3667_v39 = vpack.c.bf16 %v3665_v8, %v3666_v25  ;;  %2010 = vset.pattern.permute.xlu0 %v2257_v11  ;;  %2011 = vset.pattern.permute.xlu1 %v2257_v11  ;;  %v1721_v25 = vld [vmem:[%s3488_s5] sm:$0xff] }
 0x3c8   : > { %v1949_v23 = vpack.c.bf16 %v1512_v47, %v1511_v14 }
 0x3ca   : > { %1950 = vmatpush3.bf16.msra.mxu1 %v1949_v23 }
 0x3cb   : > { %v1476_v9 = vpop.f32.mrb[28].mxu1  ;;  %1951 = vmatprep.subr.bf16.mxu1 %v2255_v26  ;;  %v3626_v26 = vld [vmem:[#allocation12_spill] sm:$0xff] }
 0x3cc   : > { %v1478_v3 = vpop.f32.mrb[29].mxu1  ;;  %v1513_v12 = vmul.f32 %v1497_v19, %v1476_v9  ;;  %v3628_v50 = vpack.c.bf16 %v3626_v26, %v3627_v56 }
 0x3cd   : > { %v1479_v4 = vpop.f32.mrb[30].mxu1 }
 0x3ce   : > { %v1514_v31 = vmul.f32 %v1498_v16, %v1479_v4  ;;  %v1481_v38 = vpop.f32.mrb[31].mxu1  ;;  %v3421_v4 = vld [vmem:[%s3668_s3] sm:$0xff] }
 0x3cf   : > { %v1659_v38 = vsel %vm1648_vm2, %v3421_v4, 0.0 }
 0x3d0   : > { %v1952_v13 = vpack.c.bf16 %v1514_v31, %v1513_v12 }
 0x3d2   : > { %1953 = vmatpush3.bf16.msra.mxu1 %v1952_v13  ;;  %v1696_v13 = vmul.f32 %v3421_v4, %v3421_v4 }
 0x3d3   : > { %1603 = vmatprep.subr.bf16.mxu1 %v3622_v18 }
 0x3d4   : > { %v1697_v36 = vsel %vm1648_vm2, %v1696_v13, 0.0 }
 0x3d5   : > { %1928 = vmatmul.mubr.f32.vlgmr.msra.gmra.mrb[32].mxu1 %v1515_v40 }
 0x3d6   : > { %1604 = vmatpush1.bf16.msra.mxu1 %v3625_v28  ;;  %1635 = vmatprep.mubr.bf16.mxu1 %v2257_v11 }
 0x3d7   : > { %1605 = vmatprep.subr.bf16.mxu1 %v3628_v50 }
 0x3da   : > { %1606 = vmatpush1.bf16.msra.mxu1 %v3631_v2 }
 0x3db   : > { %1607 = vmatprep.subr.bf16.mxu1 %v3634_v60 }
 0x3de   : > { %1608 = vmatpush1.bf16.msra.mxu1 %v3637_v6 }
 0x3df   : > { %1609 = vmatprep.subr.bf16.mxu1 %v3640_v17 }
 0x3e2   : > { %1610 = vmatpush1.bf16.msra.mxu1 %v3643_v32 }
 0x3e3   : > { %1611 = vmatprep.subr.bf16.mxu1 %v3646_v55 }
 0x3e6   : > { %1612 = vmatpush1.bf16.msra.mxu1 %v3649_v7 }
 0x3e7   : > { %1613 = vmatprep.subr.bf16.mxu1 %v3652_v20 }
 0x3ea   : > { %1614 = vmatpush1.bf16.msra.mxu1 %v3655_v1 }
 0x3eb   : > { %1615 = vmatprep.subr.bf16.mxu1 %v3658_v53 }
 0x3ee   : > { %1616 = vmatpush1.bf16.msra.mxu1 %v3661_v10 }
 0x3ef   : > { %1617 = vmatprep.subr.bf16.mxu1 %v3664_v58 }
 0x3f2   : > { %1618 = vmatpush1.bf16.msra.mxu1 %v3667_v39 }
 0x4a8   : > { %v1582_v22 = vpop.f32.mrb[32].mxu1 }
 0x4a9   : > { %v1586_v14 = vpack.c.bf16 %v1582_v22, %v1582_v22  ;;  %v1929_v47 = vpop.f32.mrb[33].mxu1 }
 0x4ab   : > { %1636 = vmatmul.mubr.bf16.vlgmr.msra.gmra.mrb[36].mxu1 %v1586_v14 }
 0x57e   : > { %v3408_v51 = vpop.f32.mrb[36].mxu1 }
 0x57f   : > { %v3410_v23 = vpop.f32.mrb[37].mxu1  ;;  %v1671_v9 = vmul.f32 %v3408_v51, %v3408_v51 }
 0x580   : > { %v1645_v19 = vadd.f32 %v3410_v23, %v3408_v51  ;;  %v1641_v16 = vpop.f32.mrb[38].mxu1  ;;  %v1672_v3 = vmul.f32 %v3410_v23, %v3410_v23 }
 0x581   : > { %v1642_v12 = vpop.f32.mrb[39].mxu1 }
 0x582   : > { %1646 = vadd.xlane.f32.xlu0 %v1645_v19  ;;  %v1673_v31 = vadd.f32 %v1672_v3, %v1671_v9 }
 0x584   : > { %1674 = vadd.xlane.f32.xlu1 %v1673_v31 }
 0x586   : > { %1660 = vadd.xlane.f32.xlu0 %v1659_v38 }
 0x60f   : > { %v1647_v40 = vpop.xlane.xlu0 %1646 }
 0x610   : > { %v1683_v29 = vmul.f32 %v1647_v40, %v3421_v4  ;;  %v1649_v43 = vsel %vm1648_vm2, %v1647_v40, 0.0 }
 0x611   : > { %1650 = vadd.xlane.f32.xlu1 %v1649_v43  ;;  %v1675_v28 = vpop.xlane.xlu1 %1674 }
 0x612   : > { %v1684_v18 = vsel %vm1648_vm2, %v1683_v29, 0.0  ;;  %v1676_v56 = vrot.slane %v1675_v28, 4 }
 0x613   : > { %1685 = vadd.xlane.f32.xlu0 %v1684_v18  ;;  %v1661_v27 = vpop.xlane.xlu0 %1660 }
 0x614   : > { %v1662_v26 = vrot.slane %v1661_v27, 4  ;;  %v1677_v41 = vadd.f32 %v1676_v56, %v1675_v28 }
 0x615   : > { %1698 = vadd.xlane.f32.xlu1 %v1697_v36 }
 0x616   : > { %v1663_v50 = vadd.f32 %v1662_v26, %v1661_v27  ;;  %v1678_v42 = vrot.slane %v1677_v41, 2 }
 0x618   : > { %v1664_v45 = vrot.slane %v1663_v50, 2  ;;  %v1679_v48 = vadd.f32 %v1678_v42, %v1677_v41 }
 0x61a   : > { %v1665_v35 = vadd.f32 %v1664_v45, %v1663_v50  ;;  %v1680_v7 = vrot.slane %v1679_v48, 1 }
 0x61c   : > { %v1666_v55 = vrot.slane %v1665_v35, 1  ;;  %v1681_v1 = vadd.f32 %v1680_v7, %v1679_v48 }
 0x61e   : > { %v1667_v33 = vadd.f32 %v1666_v55, %v1665_v35 }
 0x69e   : > { %v1651_v2 = vpop.xlane.xlu1 %1650 }
 0x69f   : > { %v1652_v54 = vrot.slane %v1651_v2, 4 }
 0x6a0   : > { %v1686_v60 = vpop.xlane.xlu0 %1685 }
 0x6a1   : > { %v1653_v62 = vadd.f32 %v1652_v54, %v1651_v2  ;;  %v1687_v0 = vrot.slane %v1686_v60, 4 }
 0x6a2   : > { %v1699_v6 = vpop.xlane.xlu1 %1698 }
 0x6a3   : > { %v1654_v57 = vrot.slane %v1653_v62, 2  ;;  %v1688_v17 = vadd.f32 %v1687_v0, %v1686_v60  ;;  %v1700_v61 = vrot.slane %v1699_v6, 4 }
 0x6a5   : > { %v1689_v32 = vrot.slane %v1688_v17, 2  ;;  %v1701_v46 = vadd.f32 %v1700_v61, %v1699_v6  ;;  %v1655_v49 = vadd.f32 %v1654_v57, %v1653_v62 }
 0x6a7   : > { %v1702_v34 = vrot.slane %v1701_v46, 2  ;;  %v1656_v52 = vrot.slane %v1655_v49, 1  ;;  %v1690_v15 = vadd.f32 %v1689_v32, %v1688_v17 }
 0x6a9   : > { %v1657_v21 = vadd.f32 %v1656_v52, %v1655_v49  ;;  %v1691_v20 = vrot.slane %v1690_v15, 1  ;;  %v1703_v59 = vadd.f32 %v1702_v34, %v1701_v46 }
 0x6ab   : > { %1954 = vpush %v1657_v21  ;;  %v1692_v24 = vadd.f32 %v1691_v20, %v1690_v15  ;;  %v1704_v37 = vrot.slane %v1703_v59, 1 }
 0x6ac   : > { %1956 = vpush %v1667_v33 }
 0x6ad   : > { %1958 = vpush %v1681_v1  ;;  %v1705_v53 = vadd.f32 %v1704_v37, %v1703_v59 }
 0x6ae   : > { %1960 = vpush %v1692_v24 }
 0x6af   : > { %1962 = vpush %v1705_v53 }
 0x6dc   : > { %s1955_s29 = spop %1954 }
 0x6dd   : > { %s1957_s8 = spop %1956 }
 0x6de   : > { %s1669_s9 = smul.f32 256.0, %s1957_s8  ;;  %s1959_s13 = spop %1958 }
 0x6df   : > { %s1961_s14 = spop %1960 }
 0x6e0   : > { %s1670_s15 = sadd.f32 %s1955_s29, %s1669_s9  ;;  %s1694_s16 = smul.f32 2.0, %s1961_s14 }
 0x6e1   : > { %s1963_s17 = spop %1962 }
 0x6e2   : > { %s1709_s18 = smul.f32 0.00048828125, %s1670_s15  ;;  %s1695_s19 = sadd.f32 %s1959_s13, %s1694_s16 }
 0x6e3   : > { %s1707_s20 = smul.f32 256.0, %s1963_s17 }
 0x6e4   : > { %s1711_s22 = smul.f32 %s1709_s18, %s1709_s18  ;;  %v1722_v10 = vstv %s1709_s18 }
 0x6e5   : > { %s1708_s21 = sadd.f32 %s1707_s20, %s1695_s19  ;;  %v1723_v8 = vsub.f32 %v3421_v4, %v1722_v10  ;;  %s2259_s20 = smov [#allocation2]  }
 0x6e7   : > { %s1710_s23 = smul.f32 0.00048828125, %s1708_s21  ;;  %s2194_s21 = sshll.u32 %s2259_s20, 4  ;;  %s2195_s21 = int_to_ptr.vmem [resolvable:$false] %s2194_s21 }
 0x6e9   : > { %s1712_s0 = ssub.f32 %s1710_s23, %s1711_s22  ;;  %s2196_s22 = scalar_lea.vmem %s2195_s21, 512 }
 0x6eb   : > { %s1713_s2 = smax.f32 %s2258_s1, %s1712_s0  ;;  %s269_s0 = sand.u32 1, %s2244_s25  }
 0x6ec   : > { %s1714_s3 = sadd.f32 1e-05, %s1713_s2  ;;  %s1820_s1 = sshll.u32 %s269_s0, 4 }
 0x6ed   : > { %s1877_s2 = sshll.u32 %s2321_s28, 8  ;;  %s1743_s28 = scalar_lea.sflag [#allocation3], %s269_s0 }
 0x6ee   : > { %v1715_v63 = vstv %s1714_s3  ;;  %s271_s3 = scalar_lea.vmem [#allocation2], %s1820_s1  ;;  %s3441_s18 = scalar_lea.hbm %s3490_s7, %s1877_s2 }
 0x6ef   : > { %2188 = vrsqrt.f32 %v1715_v63  ;;  %s1757_s15 = sshll.u32 %s271_s3, 4  ;;  %s3443_s15 = int_to_ptr.vmem [resolvable:$true] %s1757_s15 }
 0x6f0   : > { %s2190_s19 = scalar_lea.vmem %s3443_s15, 256  ;;  %p2197_p0 = scmp.lt.s32.totalorder %s3443_s15, %s2195_s21 }
 0x6f1   : > { %p2191_p11 = scmp.ne.s32.totalorder %s3443_s15, %s2190_s19  ;;  %p2198_p1 = scmp.lt.s32.totalorder %s2196_s22, %s2190_s19 }
 0x6f3   : > { %p2192_p12 = pnand %p2191_p11, %p2338_p5  ;;  %p2199_p2 = por %p2198_p1, %p2197_p0 }
 0x6f5   : > { %p2193_p13 = pneg %p2192_p12 }
 0x6f7   : > { %p2200_p3 = pnand %p2199_p2, %p2193_p13 }
 0x6f9   : > { %v2189_v5 = vpop.eup %2188 }
 0x6fa   : > { %1964 = vpush %v2189_v5 }
 0x72b   : > { %s1965_s9 = spop %1964 }
 0x72c   : > { %v1719_v30 = vstv %s1965_s9 }
 0x72d   : > { %v1720_v58 = vmul.f32 %v1719_v30, %v1718_v44 }
 0x72f   : > { %v1724_v39 = vmul.f32 %v1723_v8, %v1720_v58  ;;  %1728 = vperm.xlu0 %2010, %v1720_v58  }
 0x731   : > { %v1725_v11 = vadd.f32 %v1724_v39, %v1721_v25 }
 0x733   : > { %1735 = vperm.xlu1 %2011, %v1725_v11  }
 0x7ae   : > { %v1729_v22 = vpop.permute.xlu0 %1728 }
 0x7af   : > { %v1731_v14 = vmul.f32 %v1729_v22, %v3408_v51  ;;  %v1732_v47 = vmul.f32 %v1729_v22, %v3410_v23 }
 0x7b2   : > { %v1736_v9 = vpop.permute.xlu1 %1735 }
 0x7b3   : > { %v1738_v19 = vadd.f32 %v1736_v9, %v1731_v14  ;;  %v1739_v16 = vadd.f32 %v1736_v9, %v1732_v47 }
 0x7b5   : > { %1740 = vst [vmem:[%s271_s3] sm:$0xff] %v1738_v19  ;;  %1741 = vst [vmem:[%s271_s3 + $0x8] sm:$0xff] %v1739_v16 }
 0x7b6   : > { %2203 = shalt.err (!%p2200_p3)
}
 0x7b7   : > { %s2204_s23 = scalar_lea.hbm %s3441_s18, 256  ;;  %s2208_s9 = scalar_lea.hbm %s3490_s7, 512 }
 0x7b8   : > { %p2205_p4 = scmp.ne.s32.totalorder %s3441_s18, %s2204_s23  ;;  %p2209_p9 = scmp.lt.u32.totalorder %s3441_s18, %s3490_s7 }
 0x7b9   : > { %p2210_p10 = scmp.lt.u32.totalorder %s2208_s9, %s2204_s23  ;;  %p2212_p12 = scmp.lt.u32.totalorder %s2204_s23, %s3441_s18 }
 0x7ba   : > { %p2206_p7 = pnand %p2205_p4, %p2338_p5 }
 0x7bb   : > { %p2211_p11 = por %p2210_p10, %p2209_p9 }
 0x7bc   : > { %p2207_p8 = pneg %p2206_p7 }
 0x7bd   : > { %p2213_p13 = por %p2212_p12, %p2211_p11 }
 0x7bf   : > { %p2214_p0 = pnand %p2213_p13, %p2207_p8 }
 0x7c1   : > { %2217 = shalt.err (!%p2214_p0)
}
 0x7c2   : > { %1966 = dma.vmem_to_hbm [thread:$0]  (%p2338_p5), %s3443_s15, 256, %s3441_s18, %s1743_s28  }
 0x7c3 PF: > { %p1972_p1 = scmp.ge.s32.totalorder %s2252_s27, 2  ;;  %s1769_s0 = sand.u32 1, %s2240_s24  }
 0x7c4   : > { %s1770_s1 = scalar_lea.sflag [#allocation3], %s1769_s0 }
 0x7c5   : > { %p1969_p2 = pnand %p1972_p1, %p2342_p6 }
 0x7c7   : > { %2235 = dma.done.wait (!%p1969_p2), %s1770_s1, 256  }
 0x7c8   : > { %2237 = vsyncadd (!%p1969_p2), %s1770_s1, 4294967040  ;;  %p17_p3 = scmp.ge.s32.totalorder %s2325_s30, 4   ;;  %s3669_s24 = smov %s2244_s25 }
 0x7c9   : > { %s3670_s25 = smov %s2248_s26  ;;  %s3671_s26 = smov %s2336_s10 }
 0x7ca   : > { %s3672_s27 = smov %s2325_s30  ;;  %19 = sbr.rel (!%p17_p3) target bundleno = 8 (0x8), region = 83 }
 0x7d1   :  { %1775 = vsyncpa [#allocation3], 1 }
 0x7d2   :  { %1777 = vsyncpa [#allocation3 + $0x1], 1 }

</bundles_post_ra>
